<compile_context>
chip_gen: v7x
topology: tpu7x:2x2x1
jax: 0.10.0
libtpu: 0.0.40
codegen_flags: <defaults>
</compile_context>

<pallas_src>
import functools

import jax
import jax.numpy as jnp
from jax.experimental import pallas as pl
from jax.experimental.pallas import tpu as pltpu

LANES = 128


def _round_up(x, m):
    return ((x + m - 1) // m) * m


def _vmem_limit_bytes():
    # Physical VMEM: 128 MiB (v5e/v6e), 64 MiB (v7x).  The scoped default
    # (16-32 MiB) throws away headroom; use ~3/4 of physical, capped at 96 MiB.
    try:
        cap = int(pltpu.get_tpu_info().vmem_capacity_bytes)
    except Exception:
        cap = 64 * 1024 * 1024
    return min(96 * 1024 * 1024, (cap * 3) // 4)


def _fold_bn(gamma, beta, mean, var, eps):
    scale = gamma / jnp.sqrt(var + eps)
    return scale, beta - mean * scale


# ------------------------------ Pallas kernel --------------------------------

def _conv_kernel(*refs, taps, ho, wo, halo_out, has_short):
    """Fused 3x3 conv (+folded-BN bias) (+fused shortcut matmul) + ReLU.

    One image per grid step.  The 3x3 conv is a single concatenated-K matmul:
    an (M, 9*Cin) im2col block is built in VMEM from 9 static contiguous
    slabs of the padded (phase-decomposed) image, then one bf16 MXU matmul
    with f32 accumulation produces all (lane-dense) output channels at once.
    """
    if has_short:
        x_ref, w_ref, b_ref, xs_ref, ws_ref, o_ref, im_ref = refs
    else:
        x_ref, w_ref, b_ref, o_ref, im_ref = refs
        xs_ref = ws_ref = None
    cin = x_ref.shape[-1]
    cp = o_ref.shape[-1]
    m = ho * wo

    # In-VMEM im2col: 9 shifted contiguous copies -> (M, 9*Cin) scratch.
    for t, (r0, c0) in enumerate(taps):
        im_ref[:, t * cin:(t + 1) * cin] = (
            x_ref[0, r0:r0 + ho, c0:c0 + wo, :].reshape(m, cin))

    # One big-K matmul (K = 9*Cin) on the MXU, f32 accumulation.
    acc = jnp.dot(im_ref[...], w_ref[...], preferred_element_type=jnp.float32)

    if has_short:
        # Fused shortcut (1x1-conv+BN, or identity): one extra K=Cin matmul
        # into the same accumulator.
        xs = xs_ref[0].reshape(m, xs_ref.shape[-1])
        acc = acc + jnp.dot(xs, ws_ref[...], preferred_element_type=jnp.float32)

    out = jnp.maximum(acc + b_ref[...], 0.0).astype(o_ref.dtype)

    if halo_out:
        # Emit directly in the next conv's padded-input layout: zero halo ring
        # + interior result.  No XLA pad/reshape between the two kernels.
        o_ref[...] = jnp.zeros(o_ref.shape, o_ref.dtype)
        o_ref[0, 1:ho + 1, 1:wo + 1, :] = out.reshape(ho, wo, cp)
    else:
        o_ref[0] = out.reshape(ho, wo, cp)


def _conv3x3_call(phases, wk, bias, *, taps, ho, wo, halo_out, shortcut=None,
                  out_dtype=jnp.bfloat16):
    n, rows, pw, cin = phases.shape
    kdim, cp = wk.shape
    m = ho * wo
    osp = (ho + 2, wo + 2) if halo_out else (ho, wo)

    in_specs = [
        pl.BlockSpec((1, rows, pw, cin), lambda i: (i, 0, 0, 0)),   # image
        pl.BlockSpec((kdim, cp), lambda i: (0, 0)),                 # folded W
        pl.BlockSpec((1, cp), lambda i: (0, 0)),                    # folded bias
    ]
    args = [phases, wk, bias]
    if shortcut is not None:
        xs, ws = shortcut
        cs = xs.shape[-1]
        in_specs += [pl.BlockSpec((1, ho, wo, cs), lambda i: (i, 0, 0, 0)),
                     pl.BlockSpec((cs, cp), lambda i: (0, 0))]
        args += [xs, ws]

    return pl.pallas_call(
        functools.partial(_conv_kernel, taps=taps, ho=ho, wo=wo,
                          halo_out=halo_out, has_short=shortcut is not None),
        out_shape=jax.ShapeDtypeStruct((n,) + osp + (cp,), out_dtype),
        grid=(n,),
        in_specs=in_specs,
        out_specs=pl.BlockSpec((1,) + osp + (cp,), lambda i: (i, 0, 0, 0)),
        scratch_shapes=[pltpu.VMEM((m, kdim), jnp.bfloat16)],   # im2col scratch
        compiler_params=pltpu.CompilerParams(
            dimension_semantics=("parallel",),                  # megacore/v7x
            vmem_limit_bytes=_vmem_limit_bytes()),
    )(*args)


# -------------------------------- JAX glue ------------------------------------

def _phase_decompose(x_nhwc, stride, ho, wo):
    """Pad (+polyphase split for stride>1) so every 3x3 tap reads a contiguous
    slab.  Returns phases of shape (N, stride^2 * PH, PW, C) and the 9 static
    (row, col) tap offsets into it.  For stride==1 this is just a zero-pad."""
    n, h, w, c = x_nhwc.shape
    s = stride
    d = 2 // s
    ph, pw = ho + d, wo + d
    xp = jnp.pad(x_nhwc,
                 ((0, 0), (1, s * ph - 1 - h), (1, s * pw - 1 - w), (0, 0)))
    if s == 1:
        phases = xp                                            # (n, ph, pw, c)
    else:
        phases = xp.reshape(n, ph, s, pw, s, c).transpose(0, 2, 4, 1, 3, 5)
        phases = phases.reshape(n, s * s * ph, pw, c)
    taps = tuple((((ky % s) * s + (kx % s)) * ph + ky // s, kx // s)
                 for ky in range(3) for kx in range(3))
    return phases, taps


def _fold_conv3x3_bn(w_oihw, gamma, beta, mean, var, *, cin_pad, cp, eps):
    """Fold BN into the 3x3 weights; pad Cin->cin_pad, Cout->cp; pack rows as
    (tap-major, channel-minor) to match the in-kernel im2col column order."""
    scale, bias = _fold_bn(gamma, beta, mean, var, eps)
    cout, cin = w_oihw.shape[0], w_oihw.shape[1]
    w = jnp.transpose(w_oihw, (2, 3, 1, 0)) * scale            # (3,3,Cin,Cout)
    w = jnp.pad(w, ((0, 0), (0, 0), (0, cin_pad - cin), (0, cp - cout)))
    wk = w.reshape(9 * cin_pad, cp).astype(jnp.bfloat16)
    b = jnp.pad(bias, (0, cp - cout)).reshape(1, cp).astype(jnp.float32)
    return wk, b


def basic_block_forward(x_nchw, params, *, stride, eps=1e-5):
    x = jnp.transpose(x_nchw, (0, 2, 3, 1)).astype(jnp.bfloat16)   # NHWC bf16
    n, h, w, cin = x.shape
    cout = params["w1"].shape[0]
    cp = _round_up(cout, LANES)                                    # lane-dense
    ho = (h - 1) // stride + 1
    wo = (w - 1) // stride + 1

    # ---- conv1 (3x3, stride, pad=1) + bn1 + ReLU  (one fused kernel) ----
    w1, b1 = _fold_conv3x3_bn(params["w1"], params["bn1_gamma"],
                              params["bn1_beta"], params["bn1_mean"],
                              params["bn1_var"], cin_pad=cin, cp=cp, eps=eps)
    ph1, taps1 = _phase_decompose(x, stride, ho, wo)
    o1 = _conv3x3_call(ph1, w1, b1, taps=taps1, ho=ho, wo=wo, halo_out=True)
    # o1: (n, ho+2, wo+2, cp) bf16 with zero halo ring == conv2's padded input.

    # ---- conv2 (3x3, s=1, pad=1) + bn2 + shortcut + ReLU (one fused kernel) --
    w2, b2 = _fold_conv3x3_bn(params["w2"], params["bn2_gamma"],
                              params["bn2_beta"], params["bn2_mean"],
                              params["bn2_var"], cin_pad=cp, cp=cp, eps=eps)
    if stride != 1 or cin != cout:
        scale_s, bias_s = _fold_bn(params["bns_gamma"], params["bns_beta"],
                                   params["bns_mean"], params["bns_var"], eps)
        ws = params["ws"][:, :, 0, 0].T * scale_s                 # (cin, cout)
        ws = jnp.pad(ws, ((0, 0), (0, cp - cout))).astype(jnp.bfloat16)
        bias2 = b2 + jnp.pad(bias_s, (0, cp - cout)).reshape(1, cp)
    else:
        ws = jnp.eye(cin, cp, dtype=jnp.bfloat16)                 # identity
        bias2 = b2
    xs = x[:, ::stride, ::stride, :]                              # (n,ho,wo,cin)

    taps2 = tuple((ky, kx) for ky in range(3) for kx in range(3))
    o2 = _conv3x3_call(o1, w2, bias2, taps=taps2, ho=ho, wo=wo,
                       halo_out=False, shortcut=(xs, ws))
    # (n, ho, wo, cp) bf16 -> slice real channels + NHWC->NCHW in one fused XLA
    # copy (chained blocks would instead stay NHWC/bf16 end-to-end).
    return jnp.transpose(o2[..., :cout], (0, 3, 1, 2)).astype(jnp.float32)


# ---------------------------- pure-JAX reference ------------------------------

def _ref_basic_block(x, params, stride, eps=1e-5):
    def conv(x, w, s, pad):
        return jax.lax.conv_general_dilated(
            x, w, window_strides=(s, s), padding=[(pad, pad), (pad, pad)],
            dimension_numbers=("NCHW", "OIHW", "NCHW"))

    def bn(x, g, b, m, v):
        inv = (g / jnp.sqrt(v + eps))[None, :, None, None]
        return (x - m[None, :, None, None]) * inv + b[None, :, None, None]

    out = jax.nn.relu(bn(conv(x, params["w1"], stride, 1),
                         params["bn1_gamma"], params["bn1_beta"],
                         params["bn1_mean"], params["bn1_var"]))
    out = bn(conv(out, params["w2"], 1, 1),
             params["bn2_gamma"], params["bn2_beta"],
             params["bn2_mean"], params["bn2_var"])
    cin, cout = x.shape[1], params["w1"].shape[0]
    if stride != 1 or cin != cout:
        sc = bn(conv(x, params["ws"], stride, 0),
                params["bns_gamma"], params["bns_beta"],
                params["bns_mean"], params["bns_var"])
    else:
        sc = x
    return jax.nn.relu(out + sc)


# ----------------------------------- main -------------------------------------

def _make_params(key, cin, cout, with_shortcut):
    ks = jax.random.split(key, 16)

    def bn_params(i):
        return (1.0 + 0.1 * jax.random.normal(ks[i], (cout,), jnp.float32),
                0.1 * jax.random.normal(ks[i + 1], (cout,), jnp.float32),
                0.05 * jax.random.normal(ks[i + 2], (cout,), jnp.float32),
                1.0 + 0.1 * jax.random.uniform(ks[i + 3], (cout,), jnp.float32))

    p = {"w1": 0.1 * jax.random.normal(ks[0], (cout, cin, 3, 3), jnp.float32),
         "w2": 0.1 * jax.random.normal(ks[1], (cout, cout, 3, 3), jnp.float32)}
    g, b, m, v = bn_params(2)
    p.update(bn1_gamma=g, bn1_beta=b, bn1_mean=m, bn1_var=v)
    g, b, m, v = bn_params(6)
    p.update(bn2_gamma=g, bn2_beta=b, bn2_mean=m, bn2_var=v)
    if with_shortcut:
        p["ws"] = 0.1 * jax.random.normal(ks[10], (cout, cin, 1, 1), jnp.float32)
        g, b, m, v = bn_params(11)
        p.update(bns_gamma=g, bns_beta=b, bns_mean=m, bns_var=v)
    return p


if __name__ == "__main__":
    key = jax.random.PRNGKey(0)
    k_x1, k_p1, k_x2, k_p2 = jax.random.split(key, 4)

    def check(x, params, stride):
        fwd = jax.jit(functools.partial(basic_block_forward, stride=stride))
        out = jax.block_until_ready(fwd(x, params))
        ref = _ref_basic_block(x, params, stride)
        n, cin, h, w = x.shape
        cout = params["w1"].shape[0]
        assert out.shape == (n, cout, (h - 1) // stride + 1,
                             (w - 1) // stride + 1), out.shape
        # bf16 MXU operands -> compare against the f32 reference with a
        # bf16-appropriate tolerance.
        rel = jnp.linalg.norm(out - ref) / (jnp.linalg.norm(ref) + 1e-6)
        assert rel < 3e-2, float(rel)
        assert jnp.allclose(out, ref, atol=2e-1, rtol=1e-1), (
            float(jnp.max(jnp.abs(out - ref))))

    # downsampling block: stride=2, Cin=16 -> Cout=32 (1x1-conv shortcut)
    x1 = jax.random.normal(k_x1, (2, 16, 16, 16), jnp.float32)
    check(x1, _make_params(k_p1, 16, 32, with_shortcut=True), stride=2)

    # identity block: stride=1, Cin=Cout=32 (identity shortcut)
    x2 = jax.random.normal(k_x2, (2, 32, 16, 16), jnp.float32)
    check(x2, _make_params(k_p2, 32, 32, with_shortcut=False), stride=1)

    print("KERNEL_OK")
</pallas_src>

<mosaic_0001>
module attributes {stable_mosaic.version = 11 : i64} {
  func.func @_conv_kernel(%arg0: i32, %arg1: memref<1x36x9x16xbf16, #tpu.memory_space<vmem>>, %arg2: memref<144x128xbf16, #tpu.memory_space<vmem>>, %arg3: memref<1x128xf32, #tpu.memory_space<vmem>>, %arg4: memref<1x10x10x128xbf16, #tpu.memory_space<vmem>>, %arg5: memref<64x144xbf16, #tpu.memory_space<vmem>>) attributes {dimension_semantics = [#tpu.dimension_semantics<parallel>], iteration_bounds = array<i64: 2>, scalar_prefetch = 0 : i64, scratch_operands = 1 : i64, tpu.core_type = #tpu.core_type<tc>, window_params = [{transform_indices = @transform_0, window_bounds = array<i64: 1, 36, 9, 16>}, {pipeline_mode = #tpu.pipeline_mode<synchronous>, transform_indices = @transform_1, window_bounds = array<i64: 144, 128>}, {pipeline_mode = #tpu.pipeline_mode<synchronous>, transform_indices = @transform_2, window_bounds = array<i64: 1, 128>}, {transform_indices = @transform_3, window_bounds = array<i64: 1, 10, 10, 128>}]} {
    %c0 = arith.constant 0 : index
    %c0_0 = arith.constant 0 : index
    %c0_1 = arith.constant 0 : index
    %c0_2 = arith.constant 0 : index
    %0 = vector.load %arg1[%c0, %c0_0, %c0_1, %c0_2] : memref<1x36x9x16xbf16, #tpu.memory_space<vmem>>, vector<1x8x8x16xbf16>
    %1 = vector.shape_cast %0 : vector<1x8x8x16xbf16> to vector<8x8x16xbf16>
    %2 = vector.shape_cast %1 : vector<8x8x16xbf16> to vector<64x16xbf16>
    %c0_3 = arith.constant 0 : index
    %c0_4 = arith.constant 0 : index
    %3 = vector.load %arg5[%c0_3, %c0_4] : memref<64x144xbf16, #tpu.memory_space<vmem>>, vector<64x16xbf16>
    tpu.vector_store %arg5[%c0_3, %c0_4], %2 {strides = array<i32>} : memref<64x144xbf16, #tpu.memory_space<vmem>>, vector<64x16xbf16>,
    %c0_5 = arith.constant 0 : index
    %c9 = arith.constant 9 : index
    %c0_6 = arith.constant 0 : index
    %c0_7 = arith.constant 0 : index
    %4 = vector.load %arg1[%c0_5, %c9, %c0_6, %c0_7] : memref<1x36x9x16xbf16, #tpu.memory_space<vmem>>, vector<1x8x8x16xbf16>
    %5 = vector.shape_cast %4 : vector<1x8x8x16xbf16> to vector<8x8x16xbf16>
    %6 = vector.shape_cast %5 : vector<8x8x16xbf16> to vector<64x16xbf16>
    %c0_8 = arith.constant 0 : index
    %c16 = arith.constant 16 : index
    %7 = vector.load %arg5[%c0_8, %c16] : memref<64x144xbf16, #tpu.memory_space<vmem>>, vector<64x16xbf16>
    tpu.vector_store %arg5[%c0_8, %c16], %6 {strides = array<i32>} : memref<64x144xbf16, #tpu.memory_space<vmem>>, vector<64x16xbf16>,
    %c0_9 = arith.constant 0 : index
    %c0_10 = arith.constant 0 : index
    %c1 = arith.constant 1 : index
    %c0_11 = arith.constant 0 : index
    %8 = vector.load %arg1[%c0_9, %c0_10, %c1, %c0_11] : memref<1x36x9x16xbf16, #tpu.memory_space<vmem>>, vector<1x8x8x16xbf16>
    %9 = vector.shape_cast %8 : vector<1x8x8x16xbf16> to vector<8x8x16xbf16>
    %10 = vector.shape_cast %9 : vector<8x8x16xbf16> to vector<64x16xbf16>
    %c0_12 = arith.constant 0 : index
    %c32 = arith.constant 32 : index
    %11 = vector.load %arg5[%c0_12, %c32] : memref<64x144xbf16, #tpu.memory_space<vmem>>, vector<64x16xbf16>
    tpu.vector_store %arg5[%c0_12, %c32], %10 {strides = array<i32>} : memref<64x144xbf16, #tpu.memory_space<vmem>>, vector<64x16xbf16>,
    %c0_13 = arith.constant 0 : index
    %c18 = arith.constant 18 : index
    %c0_14 = arith.constant 0 : index
    %c0_15 = arith.constant 0 : index
    %12 = vector.load %arg1[%c0_13, %c18, %c0_14, %c0_15] : memref<1x36x9x16xbf16, #tpu.memory_space<vmem>>, vector<1x8x8x16xbf16>
    %13 = vector.shape_cast %12 : vector<1x8x8x16xbf16> to vector<8x8x16xbf16>
    %14 = vector.shape_cast %13 : vector<8x8x16xbf16> to vector<64x16xbf16>
    %c0_16 = arith.constant 0 : index
    %c48 = arith.constant 48 : index
    %15 = vector.load %arg5[%c0_16, %c48] : memref<64x144xbf16, #tpu.memory_space<vmem>>, vector<64x16xbf16>
    tpu.vector_store %arg5[%c0_16, %c48], %14 {strides = array<i32>} : memref<64x144xbf16, #tpu.memory_space<vmem>>, vector<64x16xbf16>,
    %c0_17 = arith.constant 0 : index
    %c27 = arith.constant 27 : index
    %c0_18 = arith.constant 0 : index
    %c0_19 = arith.constant 0 : index
    %16 = vector.load %arg1[%c0_17, %c27, %c0_18, %c0_19] : memref<1x36x9x16xbf16, #tpu.memory_space<vmem>>, vector<1x8x8x16xbf16>
    %17 = vector.shape_cast %16 : vector<1x8x8x16xbf16> to vector<8x8x16xbf16>
    %18 = vector.shape_cast %17 : vector<8x8x16xbf16> to vector<64x16xbf16>
    %c0_20 = arith.constant 0 : index
    %c64 = arith.constant 64 : index
    %19 = vector.load %arg5[%c0_20, %c64] : memref<64x144xbf16, #tpu.memory_space<vmem>>, vector<64x16xbf16>
    tpu.vector_store %arg5[%c0_20, %c64], %18 {strides = array<i32>} : memref<64x144xbf16, #tpu.memory_space<vmem>>, vector<64x16xbf16>,
    %c0_21 = arith.constant 0 : index
    %c18_22 = arith.constant 18 : index
    %c1_23 = arith.constant 1 : index
    %c0_24 = arith.constant 0 : index
    %20 = vector.load %arg1[%c0_21, %c18_22, %c1_23, %c0_24] : memref<1x36x9x16xbf16, #tpu.memory_space<vmem>>, vector<1x8x8x16xbf16>
    %21 = vector.shape_cast %20 : vector<1x8x8x16xbf16> to vector<8x8x16xbf16>
    %22 = vector.shape_cast %21 : vector<8x8x16xbf16> to vector<64x16xbf16>
    %c0_25 = arith.constant 0 : index
    %c80 = arith.constant 80 : index
    %23 = vector.load %arg5[%c0_25, %c80] : memref<64x144xbf16, #tpu.memory_space<vmem>>, vector<64x16xbf16>
    tpu.vector_store %arg5[%c0_25, %c80], %22 {strides = array<i32>} : memref<64x144xbf16, #tpu.memory_space<vmem>>, vector<64x16xbf16>,
    %c0_26 = arith.constant 0 : index
    %c1_27 = arith.constant 1 : index
    %c0_28 = arith.constant 0 : index
    %c0_29 = arith.constant 0 : index
    %24 = vector.load %arg1[%c0_26, %c1_27, %c0_28, %c0_29] : memref<1x36x9x16xbf16, #tpu.memory_space<vmem>>, vector<1x8x8x16xbf16>
    %25 = vector.shape_cast %24 : vector<1x8x8x16xbf16> to vector<8x8x16xbf16>
    %26 = vector.shape_cast %25 : vector<8x8x16xbf16> to vector<64x16xbf16>
    %c0_30 = arith.constant 0 : index
    %c96 = arith.constant 96 : index
    %27 = vector.load %arg5[%c0_30, %c96] : memref<64x144xbf16, #tpu.memory_space<vmem>>, vector<64x16xbf16>
    tpu.vector_store %arg5[%c0_30, %c96], %26 {strides = array<i32>} : memref<64x144xbf16, #tpu.memory_space<vmem>>, vector<64x16xbf16>,
    %c0_31 = arith.constant 0 : index
    %c10 = arith.constant 10 : index
    %c0_32 = arith.constant 0 : index
    %c0_33 = arith.constant 0 : index
    %28 = vector.load %arg1[%c0_31, %c10, %c0_32, %c0_33] : memref<1x36x9x16xbf16, #tpu.memory_space<vmem>>, vector<1x8x8x16xbf16>
    %29 = vector.shape_cast %28 : vector<1x8x8x16xbf16> to vector<8x8x16xbf16>
    %30 = vector.shape_cast %29 : vector<8x8x16xbf16> to vector<64x16xbf16>
    %c0_34 = arith.constant 0 : index
    %c112 = arith.constant 112 : index
    %31 = vector.load %arg5[%c0_34, %c112] : memref<64x144xbf16, #tpu.memory_space<vmem>>, vector<64x16xbf16>
    tpu.vector_store %arg5[%c0_34, %c112], %30 {strides = array<i32>} : memref<64x144xbf16, #tpu.memory_space<vmem>>, vector<64x16xbf16>,
    %c0_35 = arith.constant 0 : index
    %c1_36 = arith.constant 1 : index
    %c1_37 = arith.constant 1 : index
    %c0_38 = arith.constant 0 : index
    %32 = vector.load %arg1[%c0_35, %c1_36, %c1_37, %c0_38] : memref<1x36x9x16xbf16, #tpu.memory_space<vmem>>, vector<1x8x8x16xbf16>
    %33 = vector.shape_cast %32 : vector<1x8x8x16xbf16> to vector<8x8x16xbf16>
    %34 = vector.shape_cast %33 : vector<8x8x16xbf16> to vector<64x16xbf16>
    %c0_39 = arith.constant 0 : index
    %c128 = arith.constant 128 : index
    %35 = vector.load %arg5[%c0_39, %c128] : memref<64x144xbf16, #tpu.memory_space<vmem>>, vector<64x16xbf16>
    tpu.vector_store %arg5[%c0_39, %c128], %34 {strides = array<i32>} : memref<64x144xbf16, #tpu.memory_space<vmem>>, vector<64x16xbf16>,
    %c0_40 = arith.constant 0 : index
    %c0_41 = arith.constant 0 : index
    %36 = vector.load %arg5[%c0_40, %c0_41] : memref<64x144xbf16, #tpu.memory_space<vmem>>, vector<64x144xbf16>
    %c0_42 = arith.constant 0 : index
    %c0_43 = arith.constant 0 : index
    %37 = vector.load %arg2[%c0_42, %c0_43] : memref<144x128xbf16, #tpu.memory_space<vmem>>, vector<144x128xbf16>
    %cst = arith.constant dense<0.000000e+00> : vector<64x128xf32>
    %38 = tpu.matmul %36, %37, %cst {dimension_numbers = #tpu.dot_dimension_numbers<[1], [0], [0], [1], [0, 0, 1, 1], [], []>} : vector<64x144xbf16>, vector<144x128xbf16>, vector<64x128xf32> -> vector<64x128xf32>
    %c0_44 = arith.constant 0 : index
    %c0_45 = arith.constant 0 : index
    %39 = vector.load %arg3[%c0_44, %c0_45] : memref<1x128xf32, #tpu.memory_space<vmem>>, vector<1x128xf32>
    %40 = vector.broadcast %39 : vector<1x128xf32> to vector<64x128xf32>
    %41 = arith.addf %38, %40 : vector<64x128xf32>
    %cst_46 = arith.constant 0.000000e+00 : f32
    %42 = vector.broadcast %cst_46 : f32 to vector<64x128xf32>
    %43 = arith.maximumf %41, %42 : vector<64x128xf32>
    %44 = arith.truncf %43 : vector<64x128xf32> to vector<64x128xbf16>
    %cst_47 = arith.constant 0.000000e+00 : bf16
    %45 = vector.broadcast %cst_47 : bf16 to vector<1x10x10x128xbf16>
    %c0_48 = arith.constant 0 : index
    %c0_49 = arith.constant 0 : index
    %c0_50 = arith.constant 0 : index
    %c0_51 = arith.constant 0 : index
    %46 = vector.load %arg4[%c0_48, %c0_49, %c0_50, %c0_51] : memref<1x10x10x128xbf16, #tpu.memory_space<vmem>>, vector<1x10x10x128xbf16>
    tpu.vector_store %arg4[%c0_48, %c0_49, %c0_50, %c0_51], %45 {strides = array<i32>} : memref<1x10x10x128xbf16, #tpu.memory_space<vmem>>, vector<1x10x10x128xbf16>,
    %47 = vector.shape_cast %44 : vector<64x128xbf16> to vector<8x8x128xbf16>
    %c0_52 = arith.constant 0 : index
    %c1_53 = arith.constant 1 : index
    %c1_54 = arith.constant 1 : index
    %c0_55 = arith.constant 0 : index
    %48 = vector.load %arg4[%c0_52, %c1_53, %c1_54, %c0_55] : memref<1x10x10x128xbf16, #tpu.memory_space<vmem>>, vector<1x8x8x128xbf16>
    %49 = vector.shape_cast %48 : vector<1x8x8x128xbf16> to vector<8x8x128xbf16>
    %50 = vector.shape_cast %47 : vector<8x8x128xbf16> to vector<1x8x8x128xbf16>
    tpu.vector_store %arg4[%c0_52, %c1_53, %c1_54, %c0_55], %50 {strides = array<i32>} : memref<1x10x10x128xbf16, #tpu.memory_space<vmem>>, vector<1x8x8x128xbf16>,
    return
  }
  func.func @transform_0(%arg0: i32) -> (i32, i32, i32, i32) {
    %c0_i32 = arith.constant 0 : i32
    %c0_i32_0 = arith.constant 0 : i32
    %c0_i32_1 = arith.constant 0 : i32
    %c0_i32_2 = arith.constant 0 : i32
    return %arg0, %c0_i32, %c0_i32_0, %c0_i32_1 : i32, i32, i32, i32
  }
  func.func @transform_1(%arg0: i32) -> (i32, i32) {
    %c0_i32 = arith.constant 0 : i32
    %c0_i32_0 = arith.constant 0 : i32
    %c0_i32_1 = arith.constant 0 : i32
    return %c0_i32, %c0_i32_0 : i32, i32
  }
  func.func @transform_2(%arg0: i32) -> (i32, i32) {
    %c0_i32 = arith.constant 0 : i32
    %c0_i32_0 = arith.constant 0 : i32
    %c0_i32_1 = arith.constant 0 : i32
    return %c0_i32, %c0_i32_0 : i32, i32
  }
  func.func @transform_3(%arg0: i32) -> (i32, i32, i32, i32) {
    %c0_i32 = arith.constant 0 : i32
    %c0_i32_0 = arith.constant 0 : i32
    %c0_i32_1 = arith.constant 0 : i32
    %c0_i32_2 = arith.constant 0 : i32
    return %arg0, %c0_i32, %c0_i32_0, %c0_i32_1 : i32, i32, i32, i32
  }
}

module attributes {stable_mosaic.version = 11 : i64} {
  func.func @_conv_kernel(%arg0: i32, %arg1: memref<1x10x10x128xbf16, #tpu.memory_space<vmem>>, %arg2: memref<1152x128xbf16, #tpu.memory_space<vmem>>, %arg3: memref<1x128xf32, #tpu.memory_space<vmem>>, %arg4: memref<1x8x8x16xbf16, #tpu.memory_space<vmem>>, %arg5: memref<16x128xbf16, #tpu.memory_space<vmem>>, %arg6: memref<1x8x8x128xbf16, #tpu.memory_space<vmem>>, %arg7: memref<64x1152xbf16, #tpu.memory_space<vmem>>) attributes {dimension_semantics = [#tpu.dimension_semantics<parallel>], iteration_bounds = array<i64: 2>, scalar_prefetch = 0 : i64, scratch_operands = 1 : i64, tpu.core_type = #tpu.core_type<tc>, window_params = [{transform_indices = @transform_0, window_bounds = array<i64: 1, 10, 10, 128>}, {pipeline_mode = #tpu.pipeline_mode<synchronous>, transform_indices = @transform_1, window_bounds = array<i64: 1152, 128>}, {pipeline_mode = #tpu.pipeline_mode<synchronous>, transform_indices = @transform_2, window_bounds = array<i64: 1, 128>}, {transform_indices = @transform_3, window_bounds = array<i64: 1, 8, 8, 16>}, {pipeline_mode = #tpu.pipeline_mode<synchronous>, transform_indices = @transform_4, window_bounds = array<i64: 16, 128>}, {transform_indices = @transform_5, window_bounds = array<i64: 1, 8, 8, 128>}]} {
    %c0 = arith.constant 0 : index
    %c0_0 = arith.constant 0 : index
    %c0_1 = arith.constant 0 : index
    %c0_2 = arith.constant 0 : index
    %0 = vector.load %arg1[%c0, %c0_0, %c0_1, %c0_2] : memref<1x10x10x128xbf16, #tpu.memory_space<vmem>>, vector<1x8x8x128xbf16>
    %1 = vector.shape_cast %0 : vector<1x8x8x128xbf16> to vector<8x8x128xbf16>
    %2 = vector.shape_cast %1 : vector<8x8x128xbf16> to vector<64x128xbf16>
    %c0_3 = arith.constant 0 : index
    %c0_4 = arith.constant 0 : index
    %3 = vector.load %arg7[%c0_3, %c0_4] : memref<64x1152xbf16, #tpu.memory_space<vmem>>, vector<64x128xbf16>
    tpu.vector_store %arg7[%c0_3, %c0_4], %2 {strides = array<i32>} : memref<64x1152xbf16, #tpu.memory_space<vmem>>, vector<64x128xbf16>,
    %c0_5 = arith.constant 0 : index
    %c0_6 = arith.constant 0 : index
    %c1 = arith.constant 1 : index
    %c0_7 = arith.constant 0 : index
    %4 = vector.load %arg1[%c0_5, %c0_6, %c1, %c0_7] : memref<1x10x10x128xbf16, #tpu.memory_space<vmem>>, vector<1x8x8x128xbf16>
    %5 = vector.shape_cast %4 : vector<1x8x8x128xbf16> to vector<8x8x128xbf16>
    %6 = vector.shape_cast %5 : vector<8x8x128xbf16> to vector<64x128xbf16>
    %c0_8 = arith.constant 0 : index
    %c128 = arith.constant 128 : index
    %7 = vector.load %arg7[%c0_8, %c128] : memref<64x1152xbf16, #tpu.memory_space<vmem>>, vector<64x128xbf16>
    tpu.vector_store %arg7[%c0_8, %c128], %6 {strides = array<i32>} : memref<64x1152xbf16, #tpu.memory_space<vmem>>, vector<64x128xbf16>,
    %c0_9 = arith.constant 0 : index
    %c0_10 = arith.constant 0 : index
    %c2 = arith.constant 2 : index
    %c0_11 = arith.constant 0 : index
    %8 = vector.load %arg1[%c0_9, %c0_10, %c2, %c0_11] : memref<1x10x10x128xbf16, #tpu.memory_space<vmem>>, vector<1x8x8x128xbf16>
    %9 = vector.shape_cast %8 : vector<1x8x8x128xbf16> to vector<8x8x128xbf16>
    %10 = vector.shape_cast %9 : vector<8x8x128xbf16> to vector<64x128xbf16>
    %c0_12 = arith.constant 0 : index
    %c256 = arith.constant 256 : index
    %11 = vector.load %arg7[%c0_12, %c256] : memref<64x1152xbf16, #tpu.memory_space<vmem>>, vector<64x128xbf16>
    tpu.vector_store %arg7[%c0_12, %c256], %10 {strides = array<i32>} : memref<64x1152xbf16, #tpu.memory_space<vmem>>, vector<64x128xbf16>,
    %c0_13 = arith.constant 0 : index
    %c1_14 = arith.constant 1 : index
    %c0_15 = arith.constant 0 : index
    %c0_16 = arith.constant 0 : index
    %12 = vector.load %arg1[%c0_13, %c1_14, %c0_15, %c0_16] : memref<1x10x10x128xbf16, #tpu.memory_space<vmem>>, vector<1x8x8x128xbf16>
    %13 = vector.shape_cast %12 : vector<1x8x8x128xbf16> to vector<8x8x128xbf16>
    %14 = vector.shape_cast %13 : vector<8x8x128xbf16> to vector<64x128xbf16>
    %c0_17 = arith.constant 0 : index
    %c384 = arith.constant 384 : index
    %15 = vector.load %arg7[%c0_17, %c384] : memref<64x1152xbf16, #tpu.memory_space<vmem>>, vector<64x128xbf16>
    tpu.vector_store %arg7[%c0_17, %c384], %14 {strides = array<i32>} : memref<64x1152xbf16, #tpu.memory_space<vmem>>, vector<64x128xbf16>,
    %c0_18 = arith.constant 0 : index
    %c1_19 = arith.constant 1 : index
    %c1_20 = arith.constant 1 : index
    %c0_21 = arith.constant 0 : index
    %16 = vector.load %arg1[%c0_18, %c1_19, %c1_20, %c0_21] : memref<1x10x10x128xbf16, #tpu.memory_space<vmem>>, vector<1x8x8x128xbf16>
    %17 = vector.shape_cast %16 : vector<1x8x8x128xbf16> to vector<8x8x128xbf16>
    %18 = vector.shape_cast %17 : vector<8x8x128xbf16> to vector<64x128xbf16>
    %c0_22 = arith.constant 0 : index
    %c512 = arith.constant 512 : index
    %19 = vector.load %arg7[%c0_22, %c512] : memref<64x1152xbf16, #tpu.memory_space<vmem>>, vector<64x128xbf16>
    tpu.vector_store %arg7[%c0_22, %c512], %18 {strides = array<i32>} : memref<64x1152xbf16, #tpu.memory_space<vmem>>, vector<64x128xbf16>,
    %c0_23 = arith.constant 0 : index
    %c1_24 = arith.constant 1 : index
    %c2_25 = arith.constant 2 : index
    %c0_26 = arith.constant 0 : index
    %20 = vector.load %arg1[%c0_23, %c1_24, %c2_25, %c0_26] : memref<1x10x10x128xbf16, #tpu.memory_space<vmem>>, vector<1x8x8x128xbf16>
    %21 = vector.shape_cast %20 : vector<1x8x8x128xbf16> to vector<8x8x128xbf16>
    %22 = vector.shape_cast %21 : vector<8x8x128xbf16> to vector<64x128xbf16>
    %c0_27 = arith.constant 0 : index
    %c640 = arith.constant 640 : index
    %23 = vector.load %arg7[%c0_27, %c640] : memref<64x1152xbf16, #tpu.memory_space<vmem>>, vector<64x128xbf16>
    tpu.vector_store %arg7[%c0_27, %c640], %22 {strides = array<i32>} : memref<64x1152xbf16, #tpu.memory_space<vmem>>, vector<64x128xbf16>,
    %c0_28 = arith.constant 0 : index
    %c2_29 = arith.constant 2 : index
    %c0_30 = arith.constant 0 : index
    %c0_31 = arith.constant 0 : index
    %24 = vector.load %arg1[%c0_28, %c2_29, %c0_30, %c0_31] : memref<1x10x10x128xbf16, #tpu.memory_space<vmem>>, vector<1x8x8x128xbf16>
    %25 = vector.shape_cast %24 : vector<1x8x8x128xbf16> to vector<8x8x128xbf16>
    %26 = vector.shape_cast %25 : vector<8x8x128xbf16> to vector<64x128xbf16>
    %c0_32 = arith.constant 0 : index
    %c768 = arith.constant 768 : index
    %27 = vector.load %arg7[%c0_32, %c768] : memref<64x1152xbf16, #tpu.memory_space<vmem>>, vector<64x128xbf16>
    tpu.vector_store %arg7[%c0_32, %c768], %26 {strides = array<i32>} : memref<64x1152xbf16, #tpu.memory_space<vmem>>, vector<64x128xbf16>,
    %c0_33 = arith.constant 0 : index
    %c2_34 = arith.constant 2 : index
    %c1_35 = arith.constant 1 : index
    %c0_36 = arith.constant 0 : index
    %28 = vector.load %arg1[%c0_33, %c2_34, %c1_35, %c0_36] : memref<1x10x10x128xbf16, #tpu.memory_space<vmem>>, vector<1x8x8x128xbf16>
    %29 = vector.shape_cast %28 : vector<1x8x8x128xbf16> to vector<8x8x128xbf16>
    %30 = vector.shape_cast %29 : vector<8x8x128xbf16> to vector<64x128xbf16>
    %c0_37 = arith.constant 0 : index
    %c896 = arith.constant 896 : index
    %31 = vector.load %arg7[%c0_37, %c896] : memref<64x1152xbf16, #tpu.memory_space<vmem>>, vector<64x128xbf16>
    tpu.vector_store %arg7[%c0_37, %c896], %30 {strides = array<i32>} : memref<64x1152xbf16, #tpu.memory_space<vmem>>, vector<64x128xbf16>,
    %c0_38 = arith.constant 0 : index
    %c2_39 = arith.constant 2 : index
    %c2_40 = arith.constant 2 : index
    %c0_41 = arith.constant 0 : index
    %32 = vector.load %arg1[%c0_38, %c2_39, %c2_40, %c0_41] : memref<1x10x10x128xbf16, #tpu.memory_space<vmem>>, vector<1x8x8x128xbf16>
    %33 = vector.shape_cast %32 : vector<1x8x8x128xbf16> to vector<8x8x128xbf16>
    %34 = vector.shape_cast %33 : vector<8x8x128xbf16> to vector<64x128xbf16>
    %c0_42 = arith.constant 0 : index
    %c1024 = arith.constant 1024 : index
    %35 = vector.load %arg7[%c0_42, %c1024] : memref<64x1152xbf16, #tpu.memory_space<vmem>>, vector<64x128xbf16>
    tpu.vector_store %arg7[%c0_42, %c1024], %34 {strides = array<i32>} : memref<64x1152xbf16, #tpu.memory_space<vmem>>, vector<64x128xbf16>,
    %c0_43 = arith.constant 0 : index
    %c0_44 = arith.constant 0 : index
    %36 = vector.load %arg7[%c0_43, %c0_44] : memref<64x1152xbf16, #tpu.memory_space<vmem>>, vector<64x1152xbf16>
    %c0_45 = arith.constant 0 : index
    %c0_46 = arith.constant 0 : index
    %37 = vector.load %arg2[%c0_45, %c0_46] : memref<1152x128xbf16, #tpu.memory_space<vmem>>, vector<1152x128xbf16>
    %cst = arith.constant dense<0.000000e+00> : vector<64x128xf32>
    %38 = tpu.matmul %36, %37, %cst {dimension_numbers = #tpu.dot_dimension_numbers<[1], [0], [0], [1], [0, 0, 1, 1], [], []>} : vector<64x1152xbf16>, vector<1152x128xbf16>, vector<64x128xf32> -> vector<64x128xf32>
    %c0_47 = arith.constant 0 : index
    %c0_48 = arith.constant 0 : index
    %c0_49 = arith.constant 0 : index
    %c0_50 = arith.constant 0 : index
    %39 = vector.load %arg4[%c0_47, %c0_48, %c0_49, %c0_50] : memref<1x8x8x16xbf16, #tpu.memory_space<vmem>>, vector<1x8x8x16xbf16>
    %40 = vector.shape_cast %39 : vector<1x8x8x16xbf16> to vector<8x8x16xbf16>
    %41 = vector.shape_cast %40 : vector<8x8x16xbf16> to vector<64x16xbf16>
    %c0_51 = arith.constant 0 : index
    %c0_52 = arith.constant 0 : index
    %42 = vector.load %arg5[%c0_51, %c0_52] : memref<16x128xbf16, #tpu.memory_space<vmem>>, vector<16x128xbf16>
    %cst_53 = arith.constant dense<0.000000e+00> : vector<64x128xf32>
    %43 = tpu.matmul %41, %42, %cst_53 {dimension_numbers = #tpu.dot_dimension_numbers<[1], [0], [0], [1], [0, 0, 1, 1], [], []>} : vector<64x16xbf16>, vector<16x128xbf16>, vector<64x128xf32> -> vector<64x128xf32>
    %44 = arith.addf %38, %43 : vector<64x128xf32>
    %c0_54 = arith.constant 0 : index
    %c0_55 = arith.constant 0 : index
    %45 = vector.load %arg3[%c0_54, %c0_55] : memref<1x128xf32, #tpu.memory_space<vmem>>, vector<1x128xf32>
    %46 = vector.broadcast %45 : vector<1x128xf32> to vector<64x128xf32>
    %47 = arith.addf %44, %46 : vector<64x128xf32>
    %cst_56 = arith.constant 0.000000e+00 : f32
    %48 = vector.broadcast %cst_56 : f32 to vector<64x128xf32>
    %49 = arith.maximumf %47, %48 : vector<64x128xf32>
    %50 = arith.truncf %49 : vector<64x128xf32> to vector<64x128xbf16>
    %51 = vector.shape_cast %50 : vector<64x128xbf16> to vector<8x8x128xbf16>
    %c0_57 = arith.constant 0 : index
    %c0_58 = arith.constant 0 : index
    %c0_59 = arith.constant 0 : index
    %c0_60 = arith.constant 0 : index
    %52 = vector.load %arg6[%c0_57, %c0_58, %c0_59, %c0_60] : memref<1x8x8x128xbf16, #tpu.memory_space<vmem>>, vector<1x8x8x128xbf16>
    %53 = vector.shape_cast %52 : vector<1x8x8x128xbf16> to vector<8x8x128xbf16>
    %54 = vector.shape_cast %51 : vector<8x8x128xbf16> to vector<1x8x8x128xbf16>
    tpu.vector_store %arg6[%c0_57, %c0_58, %c0_59, %c0_60], %54 {strides = array<i32>} : memref<1x8x8x128xbf16, #tpu.memory_space<vmem>>, vector<1x8x8x128xbf16>,
    return
  }
  func.func @transform_0(%arg0: i32) -> (i32, i32, i32, i32) {
    %c0_i32 = arith.constant 0 : i32
    %c0_i32_0 = arith.constant 0 : i32
    %c0_i32_1 = arith.constant 0 : i32
    %c0_i32_2 = arith.constant 0 : i32
    return %arg0, %c0_i32, %c0_i32_0, %c0_i32_1 : i32, i32, i32, i32
  }
  func.func @transform_1(%arg0: i32) -> (i32, i32) {
    %c0_i32 = arith.constant 0 : i32
    %c0_i32_0 = arith.constant 0 : i32
    %c0_i32_1 = arith.constant 0 : i32
    return %c0_i32, %c0_i32_0 : i32, i32
  }
  func.func @transform_2(%arg0: i32) -> (i32, i32) {
    %c0_i32 = arith.constant 0 : i32
    %c0_i32_0 = arith.constant 0 : i32
    %c0_i32_1 = arith.constant 0 : i32
    return %c0_i32, %c0_i32_0 : i32, i32
  }
  func.func @transform_3(%arg0: i32) -> (i32, i32, i32, i32) {
    %c0_i32 = arith.constant 0 : i32
    %c0_i32_0 = arith.constant 0 : i32
    %c0_i32_1 = arith.constant 0 : i32
    %c0_i32_2 = arith.constant 0 : i32
    return %arg0, %c0_i32, %c0_i32_0, %c0_i32_1 : i32, i32, i32, i32
  }
  func.func @transform_4(%arg0: i32) -> (i32, i32) {
    %c0_i32 = arith.constant 0 : i32
    %c0_i32_0 = arith.constant 0 : i32
    %c0_i32_1 = arith.constant 0 : i32
    return %c0_i32, %c0_i32_0 : i32, i32
  }
  func.func @transform_5(%arg0: i32) -> (i32, i32, i32, i32) {
    %c0_i32 = arith.constant 0 : i32
    %c0_i32_0 = arith.constant 0 : i32
    %c0_i32_1 = arith.constant 0 : i32
    %c0_i32_2 = arith.constant 0 : i32
    return %arg0, %c0_i32, %c0_i32_0, %c0_i32_1 : i32, i32, i32, i32
  }
}

</mosaic_0001>

<bundles_post_ra>
// kernel: basic_block_forward.2
= control target key start
LH: loop header
LB: loop body
LE: loop exit
PB: predicated region body
PF: predicated region fallthrough
CT: control target
= control target key end

     0   :  { %s1594_s12 = smov 0   ;;  %s1984_s0 = inlined_call_operand.vmem [shape: bf16[2,36,9,16], index: 0, kind: input, shape index: {}]   ;;  %s1985_s1 = inlined_call_operand.vmem [shape: bf16[144,128], index: 1, kind: input, shape index: {}]   ;;  %s1986_s2 = inlined_call_operand.vmem [shape: f32[1,128], index: 2, kind: input, shape index: {}]   ;;  %s1987_s3 = inlined_call_operand.vmem [shape: bf16[2,10,10,128], index: 3, kind: output, shape index: {}]  }
   0x1 LB: > { %s1310_s13 = sadd.s32 4294967295, %s1564_s12   ;;  %p1314_p0 = scmp.ge.s32.totalorder %s1564_s12, 1  ;;  %s1564_s12 = sphi %s1594_s12, %s13_s12  }
   0x2   : > { %p137_p1 = scmp.lt.s32.totalorder %s1564_s12, 3 }
   0x4   : > { %p138_p2 = pnand %p1314_p0, %p137_p1 }
   0x5   : > { %p161_p3 = scmp.lt.s32.totalorder (!%p138_p2), %s1310_s13, 1  ;;  %v1545_v0 = vld [vmem:[%s1985_s1] sm:$0xff] (!%p138_p2)   ;;  %v1566_v1 = vmov (!%p138_p2), 0   ;;  %v1547_v2 = vld [vmem:[%s1985_s1 + $0x8] sm:$0xff] (!%p138_p2)   ;;  %v1549_v3 = vld [vmem:[%s1985_s1 + $0x10] sm:$0xff] (!%p138_p2)   ;;  %s1567_s24 = smov (!%p138_p2), 16  }
   0x6   : > { %141 = sbr.rel (%p138_p2) target bundleno = 433 (0x1b1), region = 32  ;;  %1003 = vmatprep.subr.bf16.mxu0 (!%p138_p2), %v1566_v1  ;;  %1489 = vmatprep.subr.bf16.mxu1 (!%p138_p2), %v1566_v1  ;;  %vm271_vm0 = vsmask.f32 (!%p138_p2), 3328  ;;  %vm272_vm1 = vsmask.f32 (!%p138_p2), 7440  ;;  %s1568_s25 = smov (!%p138_p2), 48  }
   0x7   : > { %1004 = vmatpush1.bf16.msra.mxu0 (!%p138_p2), %v1545_v0  ;;  %1498 = vmatpush1.bf16.msra.mxu1 (!%p138_p2), %v1545_v0  ;;  %s1569_s26 = smov (!%p138_p2), 64   ;;  %vm1648_vm2 = vmor (!%p138_p2), %vm271_vm0, %vm272_vm1  ;;  %v1550_v39 = vld [vmem:[%s1985_s1 + $0x18] sm:$0xff] (!%p138_p2)   ;;  %s1570_s4 = smov (!%p138_p2), 32   ;;  %vm204_vm3 = vcmask (!%p138_p2), 130048   ;;  %vm250_vm4 = vcmask (!%p138_p2), 261248   ;;  %vm410_vm5 = vcmask (!%p138_p2), 392448  }
   0x8   : > { %1005 = vmatprep.subr.bf16.mxu0 (!%p138_p2), %v1566_v1  ;;  %1490 = vmatprep.subr.bf16.mxu1 (!%p138_p2), %v1566_v1  ;;  %s1571_s9 = smov (!%p138_p2), 80   ;;  %s1572_s14 = smov (!%p138_p2), 96   ;;  %vm456_vm6 = vcmask (!%p138_p2), 523648   ;;  %vm502_vm7 = vcmask (!%p138_p2), 654848   ;;  %vm659_vm8 = vcmask (!%p138_p2), 786048   ;;  %vm705_vm9 = vcmask (!%p138_p2), 917248  }
   0x9   : > { %s1573_s17 = smov (!%p138_p2), 112   ;;  %vm751_vm10 = vcmask (!%p138_p2), 1048448   ;;  %vm1201_vm11 = vcmask (!%p138_p2), 1043456   ;;  %vm1202_vm12 = vsmask.f32 (!%p138_p2), 7938  ;;  %vm1207_vm13 = vcmask (!%p138_p2), 1040384  }
   0xa   : > { %vm1208_vm14 = vsmask.f32 (!%p138_p2), 256  ;;  %vm1904_vm15 = vmand (!%p138_p2), %vm1201_vm11, %vm1202_vm12 }
   0xb   : > { %1006 = vmatpush1.bf16.msra.mxu0 (!%p138_p2), %v1547_v2  ;;  %1499 = vmatpush1.bf16.msra.mxu1 (!%p138_p2), %v1547_v2  ;;  %vm1910_vm0 = vmand (!%p138_p2), %vm1207_vm13, %vm1208_vm14 }
   0xc   : > { %1007 = vmatprep.subr.bf16.mxu0 (!%p138_p2), %v1566_v1  ;;  %1491 = vmatprep.subr.bf16.mxu1 (!%p138_p2), %v1566_v1 }
   0xd   : > { %s1995_s13 = smov (!%p161_p3, %s1310_s13), 1 }
   0xe   : > { %s1507_s18 = smul.u32 288, %s1995_s13 }
   0xf   : > { %1008 = vmatpush1.bf16.msra.mxu0 %v1549_v3  ;;  %1500 = vmatpush1.bf16.msra.mxu1 %v1549_v3  ;;  %v1551_v3 = vld [vmem:[%s1985_s1 + $0x20] sm:$0xff]  }
  0x10   : > { %s1621_s23 = scalar_lea.vmem %s1984_s0, %s1507_s18  ;;  %1009 = vmatprep.subr.bf16.mxu0 %v1566_v1  ;;  %1492 = vmatprep.subr.bf16.mxu1 %v1566_v1  ;;  %s1508_s18 = smul.u32 80, %s1995_s13 }
  0x11   : > { %v1525_v4 = vld [vmem:[%s1621_s23 + $0x48] ss:$8 sps:$4 sm:$0xff]   ;;  %v1528_v7 = vld [vmem:[%s1621_s23 + $0xf8] ss:$8 sps:$4 sm:$0xff]   ;;  %v256_v10 = vld [vmem:[%s1621_s23 + $0x4] sm:$0x1] }
  0x12   : > { %v1526_v5 = vld [vmem:[%s1621_s23 + $0xb0] ss:$8 sps:$4 sm:$0xff]   ;;  %238 = vrot.lane.b32.xlu0 %v1525_v4, %s1567_s24  ;;  %v255_v9 = vld [vmem:[%s1621_s23] sm:$0xf]  ;;  %v257_v11 = vld [vmem:[%s1621_s23 + $0x8] sm:$0xf]  ;;  %s1795_s21 = scalar_lea.vmem %s1987_s3, %s1508_s18 }
  0x13   : > { %v1527_v6 = vld [vmem:[%s1621_s23 + $0x68] ss:$8 sps:$4 sm:$0xff]   ;;  %448 = vrot.lane.b32.xlu1 %v1526_v5, %s1568_s25  ;;  %v258_v12 = vld [vmem:[%s1621_s23 + $0xc] sm:$0x1]  ;;  %v275_v13 = vshrl.u32 %v255_v9, 16  ;;  %v278_v14 = vshll.u32 %v255_v9, 16  ;;  %1010 = vmatpush1.bf16.msra.mxu0 %v1550_v39 }
  0x14   : > { %v1529_v8 = vld [vmem:[%s1621_s23 + $0x90] ss:$8 sps:$4 sm:$0xff]   ;;  %v284_v15 = vshll.u32 %v256_v10, 16  ;;  %v289_v16 = vshrl.u32 %v257_v11, 16  ;;  %v292_v17 = vshll.u32 %v257_v11, 16  ;;  %v298_v18 = vshll.u32 %v258_v12, 16  ;;  %1501 = vmatpush1.bf16.msra.mxu1 %v1550_v39  ;;  %1011 = vmatprep.subr.bf16.mxu0 %v1566_v1 }
  0x15   : > { %v277_v19 = vrot.slane %v275_v13, 4  ;;  %v280_v20 = vrot.slane %v278_v14, 5  ;;  %v1530_v23 = vld [vmem:[%s1621_s23 + $0xd8] ss:$8 sps:$4 sm:$0xff]   ;;  %v264_v27 = vld [vmem:[%s1621_s23 + $0x24] sm:$0x1]  ;;  %1493 = vmatprep.subr.bf16.mxu1 %v1566_v1 }
  0x16   : > { %242 = vrot.lane.b32.xlu0 %v1527_v6, %s1567_s24  ;;  %v286_v21 = vrot.slane %v284_v15, 5  ;;  %v291_v22 = vrot.slane %v289_v16, 4  ;;  %v294_v24 = vrot.slane %v292_v17, 5  ;;  %v300_v25 = vrot.slane %v298_v18, 5  ;;  %v263_v26 = vld [vmem:[%s1621_s23 + $0x20] sm:$0xf] }
  0x17   : > { %494 = vrot.lane.b32.xlu1 %v1528_v7, %s1569_s26  ;;  %v281_v28 = vor.u32 %v280_v20, %v277_v19  ;;  %v265_v29 = vld [vmem:[%s1621_s23 + $0x28] sm:$0xf]  ;;  %v266_v30 = vld [vmem:[%s1621_s23 + $0x2c] sm:$0x1]  ;;  %v331_v31 = vshrl.u32 %v263_v26, 16  ;;  %v334_v32 = vshll.u32 %v263_v26, 16  ;;  %1012 = vmatpush1.bf16.msra.mxu0 %v1551_v3 }
  0x18   : > { %v295_v34 = vor.u32 %v294_v24, %v291_v22  ;;  %v340_v35 = vshll.u32 %v264_v27, 16  ;;  %v345_v36 = vshrl.u32 %v265_v29, 16  ;;  %v348_v37 = vshll.u32 %v265_v29, 16  ;;  %v1361_v38 = vld [vmem:[%s1621_s23 + $0x90] sm:$0xf]  ;;  %v1552_v12 = vld [vmem:[%s1985_s1 + $0x28] sm:$0xff]   ;;  %1502 = vmatpush1.bf16.msra.mxu1 %v1551_v3  ;;  %1013 = vmatprep.subr.bf16.mxu0 %v1566_v1 }
  0x19   : > { %v282_v40 = vrot.slane %v281_v28, 4  ;;  %v333_v41 = vrot.slane %v331_v31, 4  ;;  %v336_v42 = vrot.slane %v334_v32, 5  ;;  %v354_v43 = vshll.u32 %v266_v30, 16  ;;  %v1362_v44 = vld [vmem:[%s1621_s23 + $0x94] sm:$0x1]  ;;  %1494 = vmatprep.subr.bf16.mxu1 %v1566_v1 }
  0x1a   : > { %444 = vrot.lane.b32.xlu0 %v1529_v8, %s1568_s25  ;;  %v296_v45 = vrot.slane %v295_v34, 4  ;;  %v342_v46 = vrot.slane %v340_v35, 5  ;;  %v347_v47 = vrot.slane %v345_v36, 4  ;;  %v350_v48 = vrot.slane %v348_v37, 5  ;;  %v1363_v49 = vld [vmem:[%s1621_s23 + $0x98] sm:$0xf] }
  0x1b   : > { %v287_v50 = vsel %vm1648_vm2, %v282_v40, %v286_v21  ;;  %v337_v51 = vor.u32 %v336_v42, %v333_v41  ;;  %v356_v52 = vrot.slane %v354_v43, 5  ;;  %v1364_v53 = vld [vmem:[%s1621_s23 + $0x9c] sm:$0x1]  ;;  %v524_v54 = vshrl.u32 %v1361_v38, 16  ;;  %v1369_v59 = vld [vmem:[%s1621_s23 + $0xb0] sm:$0xf]  ;;  %1014 = vmatpush1.bf16.msra.mxu0 %v1552_v12 }
  0x1c   : > { %v301_v55 = vsel %vm1648_vm2, %v296_v45, %v300_v25  ;;  %v351_v56 = vor.u32 %v350_v48, %v347_v47  ;;  %v527_v57 = vshll.u32 %v1361_v38, 16  ;;  %v533_v58 = vshll.u32 %v1362_v44, 16  ;;  %v1370_v60 = vld [vmem:[%s1621_s23 + $0xb4] sm:$0x1]  ;;  %v1371_v2 = vld [vmem:[%s1621_s23 + $0xb8] sm:$0xf]  ;;  %1503 = vmatpush1.bf16.msra.mxu1 %v1552_v12  ;;  %1015 = vmatprep.subr.bf16.mxu0 %v1566_v1 }
  0x1d   : > { %v1333_v61 = vcombine.low %v287_v50, %v301_v55  ;;  %v338_v62 = vrot.slane %v337_v51, 4  ;;  %v526_v63 = vrot.slane %v524_v54, 4  ;;  %v538_v0 = vshrl.u32 %v1363_v49, 16  ;;  %v1372_v16 = vld [vmem:[%s1621_s23 + $0xbc] sm:$0x1]  ;;  %v1553_v28 = vld [vmem:[%s1985_s1 + $0x30] sm:$0xff]   ;;  %1495 = vmatprep.subr.bf16.mxu1 %v1566_v1 }
  0x1e   : > { %490 = vrot.lane.b32.xlu0 %v1530_v23, %s1569_s26  ;;  %v352_v4 = vrot.slane %v351_v56, 4  ;;  %v529_v5 = vrot.slane %v527_v57, 5  ;;  %v535_v6 = vrot.slane %v533_v58, 5  ;;  %v541_v7 = vshll.u32 %v1363_v49, 16  ;;  %v1531_v41 = vld [vmem:[%s1621_s23 + $0x8] ss:$8 sps:$4 sm:$0xff]  }
  0x1f   : > { %398 = vrot.lane.b32.xlu1 %v1333_v61, %s1570_s4  ;;  %v343_v8 = vsel %vm1648_vm2, %v338_v62, %v342_v46  ;;  %v540_v9 = vrot.slane %v538_v0, 4  ;;  %v547_v10 = vshll.u32 %v1364_v53, 16  ;;  %v580_v11 = vshrl.u32 %v1369_v59, 16  ;;  %1016 = vmatpush1.bf16.msra.mxu0 %v1553_v28  ;;  %v259_v42 = vld [vmem:[%s1621_s23 + $0x10] sm:$0xf]  ;;  %v1557_v12 = vld [vmem:[%s1985_s1 + $0x40] sm:$0xff]  }
  0x20   : > { %v357_v13 = vsel %vm1648_vm2, %v352_v4, %v356_v52  ;;  %v530_v14 = vor.u32 %v529_v5, %v526_v63  ;;  %v543_v15 = vrot.slane %v541_v7, 5  ;;  %v583_v17 = vshll.u32 %v1369_v59, 16  ;;  %1504 = vmatpush1.bf16.msra.mxu1 %v1553_v28  ;;  %1017 = vmatprep.subr.bf16.mxu0 %v1566_v1  ;;  %v260_v45 = vld [vmem:[%s1621_s23 + $0x14] sm:$0x1]  ;;  %v261_v46 = vld [vmem:[%s1621_s23 + $0x18] sm:$0xf] }
  0x21   : > { %v1335_v18 = vcombine.low %v343_v8, %v357_v13  ;;  %v549_v19 = vrot.slane %v547_v10, 5  ;;  %v582_v20 = vrot.slane %v580_v11, 4  ;;  %v589_v21 = vshll.u32 %v1370_v60, 16  ;;  %1496 = vmatprep.subr.bf16.mxu1 %v1566_v1  ;;  %v262_v48 = vld [vmem:[%s1621_s23 + $0x1c] sm:$0x1]  ;;  %1080 = vst [vmem:[%s1795_s21] sm:$0xf] %v1566_v1 }
  0x22   : > { %v531_v22 = vrot.slane %v530_v14, 4  ;;  %v544_v23 = vor.u32 %v543_v15, %v540_v9  ;;  %v585_v24 = vrot.slane %v583_v17, 5  ;;  %v594_v25 = vshrl.u32 %v1371_v2, 16  ;;  %v1533_v54 = vld [vmem:[%s1621_s23 + $0x50] ss:$8 sps:$4 sm:$0xff]  }
  0x23   : > { %402 = vrot.lane.b32.xlu1 %v1335_v18, %s1570_s4  ;;  %v597_v26 = vshll.u32 %v1371_v2, 16  ;;  %v603_v27 = vshll.u32 %v1372_v16, 16  ;;  %v591_v34 = vrot.slane %v589_v21, 5  ;;  %v303_v47 = vshrl.u32 %v259_v42, 16  ;;  %v267_v57 = vld [vmem:[%s1621_s23 + $0x30] sm:$0xf] }
  0x24   : > { %v536_v29 = vsel %vm1648_vm2, %v531_v22, %v535_v6  ;;  %v545_v30 = vrot.slane %v544_v23, 4  ;;  %v586_v31 = vor.u32 %v585_v24, %v582_v20  ;;  %v596_v32 = vrot.slane %v594_v25, 4  ;;  %v268_v58 = vld [vmem:[%s1621_s23 + $0x34] sm:$0x1]  ;;  %v1532_v60 = vld [vmem:[%s1621_s23 + $0x28] ss:$8 sps:$4 sm:$0xff]  }
  0x25   : > { %v599_v35 = vrot.slane %v597_v26, 5  ;;  %v605_v40 = vrot.slane %v603_v27, 5  ;;  %v306_v49 = vshll.u32 %v259_v42, 16  ;;  %v312_v50 = vshll.u32 %v260_v45, 16  ;;  %v269_v0 = vld [vmem:[%s1621_s23 + $0x38] sm:$0xf] }
  0x26   : > { %v550_v36 = vsel %vm1648_vm2, %v545_v30, %v549_v19  ;;  %v587_v37 = vrot.slane %v586_v31, 4  ;;  %v317_v51 = vshrl.u32 %v261_v46, 16  ;;  %v320_v52 = vshll.u32 %v261_v46, 16  ;;  %v1554_v2 = vld [vmem:[%s1985_s1 + $0x38] sm:$0xff]   ;;  %1082 = vst [vmem:[%s1795_s21 + $0x8] sm:$0xf] %v1566_v1 }
  0x27   : > { %v1377_v38 = vcombine.low %v536_v29, %v550_v36  ;;  %v600_v39 = vor.u32 %v599_v35, %v596_v32  ;;  %v305_v55 = vrot.slane %v303_v47, 4  ;;  %v326_v56 = vshll.u32 %v262_v48, 16  ;;  %v270_v5 = vld [vmem:[%s1621_s23 + $0x3c] sm:$0x1]  ;;  %1018 = vmatpush1.bf16.msra.mxu0 %v1554_v2  ;;  %1505 = vmatpush1.bf16.msra.mxu1 %v1554_v2  ;;  %v1534_v17 = vld [vmem:[%s1621_s23 + $0x70] ss:$8 sps:$4 sm:$0xff]  }
  0x28   : > { %v592_v43 = vsel %vm1648_vm2, %v587_v37, %v591_v34  ;;  %v308_v61 = vrot.slane %v306_v49, 5  ;;  %v314_v62 = vrot.slane %v312_v50, 5  ;;  %v319_v63 = vrot.slane %v317_v51, 4  ;;  %1019 = vmatprep.subr.bf16.mxu0 %v1566_v1  ;;  %v1535_v18 = vld [vmem:[%s1621_s23 + $0x58] ss:$8 sps:$4 sm:$0xff]   ;;  %1497 = vmatprep.subr.bf16.mxu1 %v1566_v1 }
  0x29   : > { %647 = vrot.lane.b32.xlu0 %v1377_v38, %s1571_s9  ;;  %v601_v44 = vrot.slane %v600_v39, 4  ;;  %v322_v3 = vrot.slane %v320_v52, 5  ;;  %v328_v4 = vrot.slane %v326_v56, 5  ;;  %v359_v6 = vshrl.u32 %v267_v57, 16  ;;  %v1536_v30 = vld [vmem:[%s1621_s23 + $0x78] ss:$8 sps:$4 sm:$0xff]  }
  0x2a   : > { %v362_v7 = vshll.u32 %v267_v57, 16  ;;  %v309_v8 = vor.u32 %v308_v61, %v305_v55  ;;  %v368_v9 = vshll.u32 %v268_v58, 16  ;;  %v373_v10 = vshrl.u32 %v269_v0, 16  ;;  %v1365_v35 = vld [vmem:[%s1621_s23 + $0xa0] sm:$0xf] }
  0x2b   : > { %v606_v53 = vsel %vm1648_vm2, %v601_v44, %v605_v40  ;;  %v376_v11 = vshll.u32 %v269_v0, 16  ;;  %v323_v13 = vor.u32 %v322_v3, %v319_v63  ;;  %v361_v14 = vrot.slane %v359_v6, 4  ;;  %1020 = vmatpush1.bf16.msra.mxu0 %v1557_v12  ;;  %1506 = vmatpush1.bf16.msra.mxu1 %v1557_v12  ;;  %v1366_v36 = vld [vmem:[%s1621_s23 + $0xa4] sm:$0x1]  ;;  %v1367_v37 = vld [vmem:[%s1621_s23 + $0xa8] sm:$0xf] }
  0x2c   : > { %v1379_v59 = vcombine.low %v592_v43, %v606_v53  ;;  %v364_v15 = vrot.slane %v362_v7, 5  ;;  %v382_v16 = vshll.u32 %v270_v5, 16  ;;  %v310_v19 = vrot.slane %v309_v8, 4  ;;  %v1368_v39 = vld [vmem:[%s1621_s23 + $0xac] sm:$0x1] }
  0x2d   : > { %693 = vrot.lane.b32.xlu0 %v1531_v41, %s1572_s14  ;;  %v375_v20 = vrot.slane %v373_v10, 4  ;;  %v378_v21 = vrot.slane %v376_v11, 5  ;;  %v324_v22 = vrot.slane %v323_v13, 4  ;;  %v370_v24 = vrot.slane %v368_v9, 5  ;;  %v1537_v44 = vld [vmem:[%s1621_s23 + $0xa0] ss:$8 sps:$4 sm:$0xff]  }
  0x2e   : > { %651 = vrot.lane.b32.xlu1 %v1379_v59, %s1571_s9  ;;  %v365_v23 = vor.u32 %v364_v15, %v361_v14  ;;  %v315_v25 = vsel %vm1648_vm2, %v310_v19, %v314_v62  ;;  %v384_v27 = vrot.slane %v382_v16, 5  ;;  %v552_v40 = vshrl.u32 %v1365_v35, 16  ;;  %v1373_v48 = vld [vmem:[%s1621_s23 + $0xc0] sm:$0xf]  ;;  %v1374_v52 = vld [vmem:[%s1621_s23 + $0xc4] sm:$0x1] }
  0x2f   : > { %v379_v26 = vor.u32 %v378_v21, %v375_v20  ;;  %v329_v28 = vsel %vm1648_vm2, %v324_v22, %v328_v4  ;;  %v555_v41 = vshll.u32 %v1365_v35, 16  ;;  %v561_v42 = vshll.u32 %v1366_v36, 16  ;;  %v1375_v57 = vld [vmem:[%s1621_s23 + $0xc8] sm:$0xf]  ;;  %v1408_v35 = vld [vmem:[%s1621_s23 + $0x14] sm:$0x1] }
  0x30   : > { %v366_v29 = vrot.slane %v365_v23, 4  ;;  %v1334_v32 = vcombine.low %v315_v25, %v329_v28  ;;  %v566_v45 = vshrl.u32 %v1367_v37, 16  ;;  %v569_v46 = vshll.u32 %v1367_v37, 16  ;;  %v1538_v7 = vld [vmem:[%s1621_s23 + $0xc0] ss:$8 sps:$4 sm:$0xff]  }
  0x31   : > { %739 = vrot.lane.b32.xlu0 %v1533_v54, %s1573_s17  ;;  %v380_v31 = vrot.slane %v379_v26, 4  ;;  %v575_v47 = vshll.u32 %v1368_v39, 16  ;;  %v554_v49 = vrot.slane %v552_v40, 4  ;;  %v557_v50 = vrot.slane %v555_v41, 5  ;;  %v1539_v8 = vld [vmem:[%s1621_s23 + $0xe8] ss:$8 sps:$4 sm:$0xff]  }
  0x32   : > { %697 = vrot.lane.b32.xlu1 %v1532_v60, %s1572_s14  ;;  %v371_v34 = vsel %vm1648_vm2, %v366_v29, %v370_v24  ;;  %v563_v51 = vrot.slane %v561_v42, 5  ;;  %v608_v53 = vshrl.u32 %v1373_v48, 16  ;;  %v568_v54 = vrot.slane %v566_v45, 4  ;;  %v1376_v60 = vld [vmem:[%s1621_s23 + $0xcc] sm:$0x1] }
  0x33   : > { %v385_v38 = vsel %vm1648_vm2, %v380_v31, %v384_v27  ;;  %v571_v55 = vrot.slane %v569_v46, 5  ;;  %v577_v56 = vrot.slane %v575_v47, 5  ;;  %v611_v58 = vshll.u32 %v1373_v48, 16  ;;  %v1546_v21 = vld [vmem:[%s1621_s23] ss:$8 sps:$4 sm:$0xff]  }
  0x34   : > { %v1336_v43 = vcombine.low %v371_v34, %v385_v38  ;;  %v558_v59 = vor.u32 %v557_v50, %v554_v49  ;;  %v610_v61 = vrot.slane %v608_v53, 4  ;;  %v617_v62 = vshll.u32 %v1374_v52, 16  ;;  %v1541_v24 = vld [vmem:[%s1621_s23 + $0x18] ss:$8 sps:$4 sm:$0xff]   ;;  %205 = vst.msk [vmem:[#allocation2] sm:$0xff] %vm204_vm3, %v1546_v21 }
  0x35   : > { %240 = vrot.lane.b32.xlu0 %v1535_v18, %s1567_s24  ;;  %v622_v63 = vshrl.u32 %v1375_v57, 16  ;;  %v572_v0 = vor.u32 %v571_v55, %v568_v54  ;;  %v613_v2 = vrot.slane %v611_v58, 5  ;;  %v625_v3 = vshll.u32 %v1375_v57, 16  ;;  %v1540_v18 = vld [vmem:[%s1621_s23 + $0x108] ss:$8 sps:$4 sm:$0xff]  }
  0x36   : > { %743 = vrot.lane.b32.xlu1 %v1534_v17, %s1573_s17  ;;  %v631_v4 = vshll.u32 %v1376_v60, 16  ;;  %v559_v5 = vrot.slane %v558_v59, 4  ;;  %v619_v13 = vrot.slane %v617_v62, 5  ;;  %v1548_v25 = vld [vmem:[%s1621_s23 + $0x20] ss:$8 sps:$4 sm:$0xff]   ;;  %v796_v41 = vshll.u32 %v1408_v35, 16 }
  0x37   : > { %v624_v6 = vrot.slane %v622_v63, 4  ;;  %v573_v9 = vrot.slane %v572_v0, 4  ;;  %v614_v10 = vor.u32 %v613_v2, %v610_v61  ;;  %v627_v11 = vrot.slane %v625_v3, 5  ;;  %207 = vst.msk [vmem:[#allocation2 + $0x20] sm:$0xff] %vm204_vm3, %v1548_v25  ;;  %v1555_v27 = vld [vmem:[%s1621_s23 + $0x10] ss:$8 sps:$4 sm:$0xff]  }
  0x38   : > { %v564_v12 = vsel %vm1648_vm2, %v559_v5, %v563_v51  ;;  %v633_v17 = vrot.slane %v631_v4, 5  ;;  %v1543_v28 = vld [vmem:[%s1621_s23 + $0x60] ss:$8 sps:$4 sm:$0xff]   ;;  %v1556_v29 = vld [vmem:[%s1621_s23 + $0x30] ss:$8 sps:$4 sm:$0xff]   ;;  %206 = vst.msk [vmem:[#allocation2 + $0x10] sm:$0xff] %vm204_vm3, %v1555_v27 }
  0x39   : > { %400 = vrot.lane.b32.xlu0 %v1334_v32, %s1570_s4  ;;  %v578_v14 = vsel %vm1648_vm2, %v573_v9, %v577_v56  ;;  %v615_v15 = vrot.slane %v614_v10, 4  ;;  %v628_v16 = vor.u32 %v627_v11, %v624_v6  ;;  %v1405_v31 = vld [vmem:[%s1621_s23 + $0x8] sm:$0xf]  ;;  %v1406_v32 = vld [vmem:[%s1621_s23 + $0xc] sm:$0x1]  ;;  %208 = vst.msk [vmem:[#allocation2 + $0x30] sm:$0xff] %vm204_vm3, %v1556_v29 }
  0x3a   : > { %244 = vrot.lane.b32.xlu1 %v1536_v30, %s1567_s24  ;;  %v1378_v19 = vcombine.low %v564_v12, %v578_v14  ;;  %v1542_v30 = vld [vmem:[%s1621_s23 + $0x38] ss:$8 sps:$4 sm:$0xff]   ;;  %v1407_v34 = vld [vmem:[%s1621_s23 + $0x10] sm:$0xf]  ;;  %v773_v36 = vshrl.u32 %v1405_v31, 16  ;;  %v776_v37 = vshll.u32 %v1405_v31, 16 }
  0x3b   : > { %v629_v20 = vrot.slane %v628_v16, 4  ;;  %v620_v22 = vsel %vm1648_vm2, %v615_v15, %v619_v13  ;;  %v782_v38 = vshll.u32 %v1406_v32, 16  ;;  %v787_v39 = vshrl.u32 %v1407_v34, 16  ;;  %v1413_v42 = vld [vmem:[%s1621_s23 + $0x28] sm:$0xf] }
  0x3c   : > { %v790_v40 = vshll.u32 %v1407_v34, 16  ;;  %v1414_v45 = vld [vmem:[%s1621_s23 + $0x2c] sm:$0x1]  ;;  %v1415_v46 = vld [vmem:[%s1621_s23 + $0x30] sm:$0xf]  ;;  %v798_v51 = vrot.slane %v796_v41, 5 }
  0x3d   : > { %446 = vrot.lane.b32.xlu0 %v1537_v44, %s1568_s25  ;;  %v634_v23 = vsel %vm1648_vm2, %v629_v20, %v633_v17  ;;  %v778_v44 = vrot.slane %v776_v37, 5  ;;  %v1544_v47 = vld [vmem:[%s1621_s23 + $0x80] ss:$8 sps:$4 sm:$0xff]   ;;  %v784_v48 = vrot.slane %v782_v38, 5  ;;  %v789_v49 = vrot.slane %v787_v39, 4 }
  0x3e   : > { %404 = vrot.lane.b32.xlu1 %v1336_v43, %s1570_s4  ;;  %v1380_v26 = vcombine.low %v620_v22, %v634_v23  ;;  %v775_v43 = vrot.slane %v773_v36, 4  ;;  %v792_v50 = vrot.slane %v790_v40, 5  ;;  %v1416_v52 = vld [vmem:[%s1621_s23 + $0x34] sm:$0x1]  ;;  %v829_v54 = vshrl.u32 %v1413_v42, 16 }
  0x3f   : > { %v832_v55 = vshll.u32 %v1413_v42, 16  ;;  %v838_v56 = vshll.u32 %v1414_v45, 16  ;;  %v1409_v57 = vld [vmem:[%s1621_s23 + $0x18] sm:$0xf]  ;;  %v843_v59 = vshrl.u32 %v1415_v46, 16  ;;  %v846_v60 = vshll.u32 %v1415_v46, 16 }
  0x40   : > { %v779_v53 = vor.u32 %v778_v44, %v775_v43  ;;  %v793_v58 = vor.u32 %v792_v50, %v789_v49  ;;  %v852_v61 = vshll.u32 %v1416_v52, 16  ;;  %v1410_v62 = vld [vmem:[%s1621_s23 + $0x1c] sm:$0x1]  ;;  %v831_v0 = vrot.slane %v829_v54, 4  ;;  %v1411_v4 = vld [vmem:[%s1621_s23 + $0x20] sm:$0xf] }
  0x41   : > { %492 = vrot.lane.b32.xlu0 %v1539_v8, %s1569_s26  ;;  %v834_v2 = vrot.slane %v832_v55, 5  ;;  %v840_v3 = vrot.slane %v838_v56, 5  ;;  %v845_v6 = vrot.slane %v843_v59, 4  ;;  %1083 = vst [vmem:[%s1795_s21 + $0xc] sm:$0x1] %v1566_v1  ;;  %v801_v11 = vshrl.u32 %v1409_v57, 16 }
  0x42   : > { %450 = vrot.lane.b32.xlu1 %v1538_v7, %s1568_s25  ;;  %v780_v63 = vrot.slane %v779_v53, 4  ;;  %v794_v5 = vrot.slane %v793_v58, 4  ;;  %v848_v7 = vrot.slane %v846_v60, 5  ;;  %v854_v8 = vrot.slane %v852_v61, 5  ;;  %1081 = vst [vmem:[%s1795_s21 + $0x4] sm:$0x1] %v1566_v1 }
  0x43   : > { %1084 = vst [vmem:[%s1795_s21 + $0x10] sm:$0xf] %v1566_v1  ;;  %1085 = vst [vmem:[%s1795_s21 + $0x14] sm:$0x1] %v1566_v1  ;;  %v835_v10 = vor.u32 %v834_v2, %v831_v0  ;;  %v804_v12 = vshll.u32 %v1409_v57, 16  ;;  %v810_v16 = vshll.u32 %v1410_v62, 16 }
  0x44   : > { %1086 = vst [vmem:[%s1795_s21 + $0x18] sm:$0xf] %v1566_v1  ;;  %1087 = vst [vmem:[%s1795_s21 + $0x1c] sm:$0x1] %v1566_v1  ;;  %v785_v9 = vsel %vm1648_vm2, %v780_v63, %v784_v48  ;;  %v799_v13 = vsel %vm1648_vm2, %v794_v5, %v798_v51  ;;  %v849_v14 = vor.u32 %v848_v7, %v845_v6  ;;  %v1412_v15 = vld [vmem:[%s1621_s23 + $0x24] sm:$0x1] }
  0x45   : > { %649 = vrot.lane.b32.xlu0 %v1378_v19, %s1571_s9  ;;  %1088 = vst [vmem:[%s1795_s21 + $0x20] sm:$0xf] %v1566_v1  ;;  %1089 = vst [vmem:[%s1795_s21 + $0x24] sm:$0x1] %v1566_v1  ;;  %v815_v17 = vshrl.u32 %v1411_v4, 16  ;;  %v1421_v19 = vcombine.low %v785_v9, %v799_v13  ;;  %v803_v20 = vrot.slane %v801_v11, 4 }
  0x46   : > { %496 = vrot.lane.b32.xlu1 %v1540_v18, %s1569_s26  ;;  %1090 = vst [vmem:[%s1795_s21 + $0x28] sm:$0xf] %v1566_v1  ;;  %1091 = vst [vmem:[%s1795_s21 + $0x2c] sm:$0x1] %v1566_v1  ;;  %v1417_v18 = vld [vmem:[%s1621_s23 + $0x38] sm:$0xf] }
  0x47   : > { %1092 = vst [vmem:[%s1795_s21 + $0x30] sm:$0xf] %v1566_v1  ;;  %1093 = vst [vmem:[%s1795_s21 + $0x34] sm:$0x1] %v1566_v1  ;;  %v806_v21 = vrot.slane %v804_v12, 5  ;;  %v850_v22 = vrot.slane %v849_v14, 4 }
  0x48   : > { %1094 = vst [vmem:[%s1795_s21 + $0x38] sm:$0xf] %v1566_v1  ;;  %1095 = vst [vmem:[%s1795_s21 + $0x3c] sm:$0x1] %v1566_v1  ;;  %v817_v23 = vrot.slane %v815_v17, 4  ;;  %v812_v32 = vrot.slane %v810_v16, 5 }
  0x49   : > { %695 = vrot.lane.b32.xlu0 %v1541_v24, %s1572_s14  ;;  %1096 = vst [vmem:[%s1795_s21 + $0x40] sm:$0xf] %v1566_v1  ;;  %1097 = vst [vmem:[%s1795_s21 + $0x44] sm:$0x1] %v1566_v1  ;;  %v818_v24 = vshll.u32 %v1411_v4, 16  ;;  %v807_v27 = vor.u32 %v806_v21, %v803_v20  ;;  %v855_v31 = vsel %vm1648_vm2, %v850_v22, %v854_v8  ;;  %v860_v36 = vshll.u32 %v1417_v18, 16 }
  0x4a   : > { %653 = vrot.lane.b32.xlu1 %v1380_v26, %s1571_s9  ;;  %1098 = vst [vmem:[%s1795_s21 + $0x48] sm:$0xf] %v1566_v1  ;;  %1099 = vst [vmem:[%s1795_s21 + $0x4c] sm:$0x1] %v1566_v1  ;;  %v836_v1 = vrot.slane %v835_v10, 4 }
  0x4b   : > { %v1418_v25 = vld [vmem:[%s1621_s23 + $0x3c] sm:$0x1]  ;;  %900 = vst.msk [vmem:[#allocation2 + $0x8] sm:$0xff] %vm204_vm3, %v1421_v19  ;;  %v1419_v29 = vld [vmem:[%s1621_s23 + $0x40] sm:$0xf]  ;;  %v820_v34 = vrot.slane %v818_v24, 5 }
  0x4c   : > { %v841_v26 = vsel %vm1648_vm2, %v836_v1, %v840_v3  ;;  %v1420_v35 = vld [vmem:[%s1621_s23 + $0x44] sm:$0x1]  ;;  %v808_v38 = vrot.slane %v807_v27, 4  ;;  %v866_v40 = vshll.u32 %v1418_v25, 16  ;;  %v862_v43 = vrot.slane %v860_v36, 5 }
  0x4d   : > { %741 = vrot.lane.b32.xlu0 %v1543_v28, %s1573_s17  ;;  %v824_v28 = vshll.u32 %v1412_v15, 16  ;;  %v1423_v37 = vcombine.low %v841_v26, %v855_v31  ;;  %v821_v41 = vor.u32 %v820_v34, %v817_v23  ;;  %v871_v44 = vshrl.u32 %v1419_v29, 16  ;;  %v1898_v34 = vld [vmem:[%s1986_s2] ss:$0 sm:$0xff] }
  0x4e   : > { %699 = vrot.lane.b32.xlu1 %v1542_v30, %s1572_s14  ;;  %v857_v30 = vshrl.u32 %v1417_v18, 16  ;;  %v874_v45 = vshll.u32 %v1419_v29, 16  ;;  %v880_v46 = vshll.u32 %v1420_v35, 16  ;;  %v868_v51 = vrot.slane %v866_v40, 5 }
  0x4f   : > { %v826_v42 = vrot.slane %v824_v28, 5  ;;  %902 = vst.msk [vmem:[#allocation2 + $0x28] sm:$0xff] %vm204_vm3, %v1423_v37  ;;  %v822_v48 = vrot.slane %v821_v41, 4  ;;  %v873_v50 = vrot.slane %v871_v44, 4 }
  0x50   : > { %v859_v39 = vrot.slane %v857_v30, 4  ;;  %v876_v52 = vrot.slane %v874_v45, 5  ;;  %v882_v58 = vrot.slane %v880_v46, 5 }
  0x51   : > { %v827_v54 = vsel %vm1648_vm2, %v822_v48, %v826_v42 }
  0x52   : > { %745 = vrot.lane.b32.xlu1 %v1544_v47, %s1573_s17  ;;  %v813_v47 = vsel %vm1648_vm2, %v808_v38, %v812_v32  ;;  %v863_v49 = vor.u32 %v862_v43, %v859_v39  ;;  %v905_v53 = vld [vmem:[#allocation2 + $0x8] sm:$0xff]  ;;  %v877_v57 = vor.u32 %v876_v52, %v873_v50 }
  0x53   : > { %1435 = vmatprep.mubr.msk.bf16.mxu0 %vm204_vm3, %v905_v53  ;;  %v1422_v56 = vcombine.low %v813_v47, %v827_v54 }
  0x54   : > { %v864_v55 = vrot.slane %v863_v49, 4  ;;  %v878_v60 = vrot.slane %v877_v57, 4  ;;  %v1447_v57 = vld [vmem:[%s1795_s21 + $0x8] sm:$0xf] }
  0x55   : > { %901 = vst.msk [vmem:[#allocation2 + $0x18] sm:$0xff] %vm204_vm3, %v1422_v56 }
  0x56   : > { %v869_v59 = vsel %vm1648_vm2, %v864_v55, %v868_v51  ;;  %v909_v61 = vld [vmem:[#allocation2 + $0x28] sm:$0xff]  ;;  %v883_v62 = vsel %vm1648_vm2, %v878_v60, %v882_v58 }
  0x57   : > { %1437 = vmatprep.mubr.msk.bf16.mxu1 %vm204_vm3, %v909_v61  ;;  %v1424_v63 = vcombine.low %v869_v59, %v883_v62  ;;  %v1449_v59 = vld [vmem:[%s1795_s21 + $0xc] sm:$0x1] }
  0x59   : > { %903 = vst.msk [vmem:[#allocation2 + $0x38] sm:$0xff] %vm204_vm3, %v1424_v63 }
  0x5c   : > { %v907_v15 = vld [vmem:[#allocation2 + $0x18] sm:$0xff] }
  0x60   : > { %v911_v1 = vld [vmem:[#allocation2 + $0x38] sm:$0xff] }
  0x84   : > { %v239_v0 = vpop.permute.xlu0 %238 }
  0x85   : > { %251 = vst.msk [vmem:[#allocation2] sm:$0xff] %vm250_vm4, %v239_v0  ;;  %v449_v2 = vpop.permute.xlu1 %448 }
  0x88   : > { %v243_v3 = vpop.permute.xlu0 %242 }
  0x89   : > { %253 = vst.msk [vmem:[#allocation2 + $0x20] sm:$0xff] %vm250_vm4, %v243_v3  ;;  %v495_v4 = vpop.permute.xlu1 %494 }
  0x8c   : > { %v445_v5 = vpop.permute.xlu0 %444 }
  0x90   : > { %v491_v33 = vpop.permute.xlu0 %490 }
  0x91   : > { %v399_v6 = vpop.permute.xlu1 %398 }
  0x92   : > { %411 = vst.msk [vmem:[#allocation2] sm:$0xff] %vm410_vm5, %v399_v6 }
  0x93   : > { %457 = vst.msk [vmem:[#allocation2] sm:$0xff] %vm456_vm6, %v445_v5  ;;  %v1453_v5 = vld [vmem:[%s1795_s21 + $0x14] sm:$0x1] }
  0x94   : > { %503 = vst.msk [vmem:[#allocation2] sm:$0xff] %vm502_vm7, %v491_v33 }
  0x95   : > { %v403_v7 = vpop.permute.xlu1 %402 }
  0x96   : > { %413 = vst.msk [vmem:[#allocation2 + $0x20] sm:$0xff] %vm410_vm5, %v403_v7 }
  0x97   : > { %459 = vst.msk [vmem:[#allocation2 + $0x20] sm:$0xff] %vm456_vm6, %v449_v2 }
  0x98   : > { %505 = vst.msk [vmem:[#allocation2 + $0x20] sm:$0xff] %vm502_vm7, %v495_v4  ;;  %v1451_v4 = vld [vmem:[%s1795_s21 + $0x10] sm:$0xf] }
  0x9b   : > { %v648_v8 = vpop.permute.xlu0 %647 }
  0x9c   : > { %660 = vst.msk [vmem:[#allocation2] sm:$0xff] %vm659_vm8, %v648_v8 }
  0x9f   : > { %v694_v9 = vpop.permute.xlu0 %693 }
  0xa0   : > { %v652_v10 = vpop.permute.xlu1 %651  ;;  %706 = vst.msk [vmem:[#allocation2] sm:$0xff] %vm705_vm9, %v694_v9 }
  0xa1   : > { %662 = vst.msk [vmem:[#allocation2 + $0x20] sm:$0xff] %vm659_vm8, %v652_v10 }
  0xa3   : > { %v740_v11 = vpop.permute.xlu0 %739 }
  0xa4   : > { %v698_v12 = vpop.permute.xlu1 %697  ;;  %752 = vst.msk [vmem:[#allocation2] sm:$0xff] %vm751_vm10, %v740_v11 }
  0xa5   : > { %708 = vst.msk [vmem:[#allocation2 + $0x20] sm:$0xff] %vm705_vm9, %v698_v12 }
  0xa7   : > { %v241_v13 = vpop.permute.xlu0 %240 }
  0xa8   : > { %v744_v14 = vpop.permute.xlu1 %743  ;;  %252 = vst.msk [vmem:[#allocation2 + $0x10] sm:$0xff] %vm250_vm4, %v241_v13  ;;  %v1463_v13 = vld [vmem:[%s1795_s21 + $0x28] sm:$0xf] }
  0xa9   : > { %754 = vst.msk [vmem:[#allocation2 + $0x20] sm:$0xff] %vm751_vm10, %v744_v14  ;;  %v1465_v14 = vld [vmem:[%s1795_s21 + $0x2c] sm:$0x1] }
  0xab   : > { %v401_v16 = vpop.permute.xlu0 %400  ;;  %v904_v17 = vld [vmem:[#allocation2] sm:$0xff] }
  0xac   : > { %v245_v18 = vpop.permute.xlu1 %244  ;;  %412 = vst.msk [vmem:[#allocation2 + $0x10] sm:$0xff] %vm410_vm5, %v401_v16  ;;  %1036 = vmatmul.mubr.bf16.vlgmr.msra.gmra.mrb[0].mxu0 %v904_v17 }
  0xad   : > { %254 = vst.msk [vmem:[#allocation2 + $0x30] sm:$0xff] %vm250_vm4, %v245_v18  ;;  %1436 = vmatprep.mubr.msk.bf16.mxu0 %vm204_vm3, %v907_v15 }
  0xaf   : > { %v447_v19 = vpop.permute.xlu0 %446 }
  0xb0   : > { %v405_v20 = vpop.permute.xlu1 %404  ;;  %v908_v21 = vld [vmem:[#allocation2 + $0x20] sm:$0xff]  ;;  %458 = vst.msk [vmem:[#allocation2 + $0x10] sm:$0xff] %vm456_vm6, %v447_v19 }
  0xb1   : > { %414 = vst.msk [vmem:[#allocation2 + $0x30] sm:$0xff] %vm410_vm5, %v405_v20  ;;  %1052 = vmatmul.mubr.bf16.vlgmr.msra.gmra.mrb[0].mxu1 %v908_v21  ;;  %v1467_v20 = vld [vmem:[%s1795_s21 + $0x30] sm:$0xf]  ;;  %v1469_v21 = vld [vmem:[%s1795_s21 + $0x34] sm:$0x1] }
  0xb2   : > { %1438 = vmatprep.mubr.msk.bf16.mxu1 %vm204_vm3, %v911_v1 }
  0xb3   : > { %v493_v22 = vpop.permute.xlu0 %492 }
  0xb4   : > { %v451_v23 = vpop.permute.xlu1 %450  ;;  %504 = vst.msk [vmem:[#allocation2 + $0x10] sm:$0xff] %vm502_vm7, %v493_v22 }
  0xb5   : > { %460 = vst.msk [vmem:[#allocation2 + $0x30] sm:$0xff] %vm456_vm6, %v451_v23 }
  0xb7   : > { %v650_v24 = vpop.permute.xlu0 %649 }
  0xb8   : > { %v497_v25 = vpop.permute.xlu1 %496  ;;  %661 = vst.msk [vmem:[#allocation2 + $0x10] sm:$0xff] %vm659_vm8, %v650_v24 }
  0xb9   : > { %506 = vst.msk [vmem:[#allocation2 + $0x30] sm:$0xff] %vm502_vm7, %v497_v25 }
  0xbb   : > { %v696_v26 = vpop.permute.xlu0 %695 }
  0xbc   : > { %v654_v27 = vpop.permute.xlu1 %653  ;;  %707 = vst.msk [vmem:[#allocation2 + $0x10] sm:$0xff] %vm705_vm9, %v696_v26 }
  0xbd   : > { %663 = vst.msk [vmem:[#allocation2 + $0x30] sm:$0xff] %vm659_vm8, %v654_v27 }
  0xbf   : > { %v742_v28 = vpop.permute.xlu0 %741 }
  0xc0   : > { %v700_v29 = vpop.permute.xlu1 %699  ;;  %753 = vst.msk [vmem:[#allocation2 + $0x10] sm:$0xff] %vm751_vm10, %v742_v28 }
  0xc1   : > { %709 = vst.msk [vmem:[#allocation2 + $0x30] sm:$0xff] %vm705_vm9, %v700_v29 }
  0xc4   : > { %v746_v30 = vpop.permute.xlu1 %745 }
  0xc5   : > { %755 = vst.msk [vmem:[#allocation2 + $0x30] sm:$0xff] %vm751_vm10, %v746_v30 }
  0xc7   : > { %v906_v31 = vld [vmem:[#allocation2 + $0x10] sm:$0xff] }
  0xc8   : > { %1044 = vmatmul.mubr.bf16.gmra.mrb[4].mxu0 %v906_v31 }
  0xcc   : > { %v910_v32 = vld [vmem:[#allocation2 + $0x30] sm:$0xff] }
  0xcd   : > { %1060 = vmatmul.mubr.bf16.gmra.mrb[4].mxu1 %v910_v32 }
 0x17f   : > { %v1037_v35 = vpop.f32.mrb[0].mxu0 }
 0x180   : > { %v1038_v36 = vadd.f32 %v1898_v34, %v1037_v35  ;;  %v1039_v37 = vpop.f32.mrb[1].mxu0 }
 0x181   : > { %v1040_v38 = vpop.f32.mrb[2].mxu0 }
 0x182   : > { %v1068_v39 = vmax.f32 %v1038_v36, 0.0  ;;  %v1041_v40 = vadd.f32 %v1898_v34, %v1040_v38  ;;  %v1042_v41 = vpop.f32.mrb[3].mxu0 }
 0x184   : > { %v1481_v42 = vpack.c.bf16 %v1068_v39, %v1068_v39  ;;  %v1053_v43 = vpop.f32.mrb[0].mxu1  ;;  %v1069_v44 = vmax.f32 %v1041_v40, 0.0 }
 0x185   : > { %v1054_v45 = vadd.f32 %v1898_v34, %v1053_v43  ;;  %v1055_v46 = vpop.f32.mrb[1].mxu1 }
 0x186   : > { %v1121_v47 = vshrl.u32 %v1481_v42, 16  ;;  %v1124_v48 = vshll.u32 %v1481_v42, 16  ;;  %v1482_v49 = vpack.c.bf16 %v1069_v44, %v1069_v44  ;;  %v1056_v50 = vpop.f32.mrb[2].mxu1 }
 0x187   : > { %v1072_v51 = vmax.f32 %v1054_v45, 0.0  ;;  %v1057_v52 = vadd.f32 %v1898_v34, %v1056_v50  ;;  %v1058_v53 = vpop.f32.mrb[3].mxu1 }
 0x188   : > { %v1123_v54 = vrot.slane %v1121_v47, 7  ;;  %v1129_v56 = vshrl.u32 %v1482_v49, 16  ;;  %v1132_v2 = vshll.u32 %v1482_v49, 16 }
 0x189   : > { %v1485_v60 = vpack.c.bf16 %v1072_v51, %v1072_v51  ;;  %v1073_v61 = vmax.f32 %v1057_v52, 0.0  ;;  %v1455_v51 = vld [vmem:[%s1795_s21 + $0x18] sm:$0xf]  ;;  %v1457_v52 = vld [vmem:[%s1795_s21 + $0x1c] sm:$0x1] }
 0x18a   : > { %v1126_v62 = vor.u32 %v1124_v48, %v1123_v54  ;;  %v1127_v63 = vrot.slane %v1123_v54, 4  ;;  %v1131_v0 = vrot.slane %v1129_v56, 7 }
 0x18b   : > { %v1153_v3 = vshrl.u32 %v1485_v60, 16  ;;  %v1486_v6 = vpack.c.bf16 %v1073_v61, %v1073_v61  ;;  %v1156_v11 = vshll.u32 %v1485_v60, 16 }
 0x18c   : > { %v1205_v33 = vsel %vm1904_vm15, %v1126_v62, %v1447_v57  ;;  %v1211_v7 = vsel %vm1910_vm0, %v1127_v63, %v1449_v59  ;;  %v1134_v8 = vor.u32 %v1132_v2, %v1131_v0  ;;  %v1135_v9 = vrot.slane %v1131_v0, 4  ;;  %v1459_v62 = vld [vmem:[%s1795_s21 + $0x20] sm:$0xf]  ;;  %v1461_v63 = vld [vmem:[%s1795_s21 + $0x24] sm:$0x1] }
 0x18d   : > { %1448 = vst [vmem:[%s1795_s21 + $0x8] sm:$0xf] %v1205_v33  ;;  %1450 = vst [vmem:[%s1795_s21 + $0xc] sm:$0x1] %v1211_v7  ;;  %v1155_v10 = vrot.slane %v1153_v3, 7  ;;  %v1161_v12 = vshrl.u32 %v1486_v6, 16 }
 0x18e   : > { %v1214_v15 = vsel %vm1904_vm15, %v1134_v8, %v1451_v4  ;;  %v1217_v16 = vsel %vm1910_vm0, %v1135_v9, %v1453_v5  ;;  %v1164_v1 = vshll.u32 %v1486_v6, 16  ;;  %v1471_v7 = vld [vmem:[%s1795_s21 + $0x38] sm:$0xf]  ;;  %v1473_v8 = vld [vmem:[%s1795_s21 + $0x3c] sm:$0x1] }
 0x18f   : > { %v1158_v17 = vor.u32 %v1156_v11, %v1155_v10  ;;  %v1159_v18 = vrot.slane %v1155_v10, 4  ;;  %1452 = vst [vmem:[%s1795_s21 + $0x10] sm:$0xf] %v1214_v15  ;;  %1454 = vst [vmem:[%s1795_s21 + $0x14] sm:$0x1] %v1217_v16  ;;  %v1163_v19 = vrot.slane %v1161_v12, 7 }
 0x190   : > { %v1475_v15 = vld [vmem:[%s1795_s21 + $0x40] sm:$0xf]  ;;  %v1477_v16 = vld [vmem:[%s1795_s21 + $0x44] sm:$0x1] }
 0x191   : > { %v1232_v22 = vsel %vm1904_vm15, %v1158_v17, %v1463_v13  ;;  %v1235_v23 = vsel %vm1910_vm0, %v1159_v18, %v1465_v14  ;;  %v1166_v24 = vor.u32 %v1164_v1, %v1163_v19  ;;  %v1167_v25 = vrot.slane %v1163_v19, 4 }
 0x192   : > { %1464 = vst [vmem:[%s1795_s21 + $0x28] sm:$0xf] %v1232_v22  ;;  %1466 = vst [vmem:[%s1795_s21 + $0x2c] sm:$0x1] %v1235_v23 }
 0x193   : > { %v1238_v26 = vsel %vm1904_vm15, %v1166_v24, %v1467_v20  ;;  %v1241_v27 = vsel %vm1910_vm0, %v1167_v25, %v1469_v21 }
 0x194   : > { %1468 = vst [vmem:[%s1795_s21 + $0x30] sm:$0xf] %v1238_v26  ;;  %1470 = vst [vmem:[%s1795_s21 + $0x34] sm:$0x1] %v1241_v27 }
 0x19b   : > { %v1045_v28 = vpop.f32.mrb[4].mxu0 }
 0x19c   : > { %v1046_v29 = vadd.f32 %v1898_v34, %v1045_v28  ;;  %v1047_v30 = vpop.f32.mrb[5].mxu0 }
 0x19d   : > { %v1048_v31 = vpop.f32.mrb[6].mxu0 }
 0x19e   : > { %v1070_v32 = vmax.f32 %v1046_v29, 0.0  ;;  %v1049_v35 = vadd.f32 %v1898_v34, %v1048_v31  ;;  %v1050_v36 = vpop.f32.mrb[7].mxu0 }
 0x1a0   : > { %v1483_v37 = vpack.c.bf16 %v1070_v32, %v1070_v32  ;;  %v1061_v38 = vpop.f32.mrb[4].mxu1  ;;  %v1071_v39 = vmax.f32 %v1049_v35, 0.0 }
 0x1a1   : > { %v1062_v40 = vadd.f32 %v1898_v34, %v1061_v38  ;;  %v1063_v41 = vpop.f32.mrb[5].mxu1 }
 0x1a2   : > { %v1137_v42 = vshrl.u32 %v1483_v37, 16  ;;  %v1140_v43 = vshll.u32 %v1483_v37, 16  ;;  %v1484_v44 = vpack.c.bf16 %v1071_v39, %v1071_v39  ;;  %v1064_v45 = vpop.f32.mrb[6].mxu1 }
 0x1a3   : > { %v1074_v46 = vmax.f32 %v1062_v40, 0.0  ;;  %v1065_v47 = vadd.f32 %v1898_v34, %v1064_v45  ;;  %v1066_v48 = vpop.f32.mrb[7].mxu1 }
 0x1a4   : > { %v1139_v49 = vrot.slane %v1137_v42, 7  ;;  %v1145_v50 = vshrl.u32 %v1484_v44, 16  ;;  %v1148_v60 = vshll.u32 %v1484_v44, 16 }
 0x1a5   : > { %v1487_v53 = vpack.c.bf16 %v1074_v46, %v1074_v46  ;;  %v1075_v54 = vmax.f32 %v1065_v47, 0.0 }
 0x1a6   : > { %v1142_v56 = vor.u32 %v1140_v43, %v1139_v49  ;;  %v1143_v57 = vrot.slane %v1139_v49, 4  ;;  %v1147_v59 = vrot.slane %v1145_v50, 7 }
 0x1a7   : > { %v1169_v61 = vshrl.u32 %v1487_v53, 16  ;;  %v1488_v0 = vpack.c.bf16 %v1075_v54, %v1075_v54  ;;  %v1172_v6 = vshll.u32 %v1487_v53, 16 }
 0x1a8   : > { %v1220_v34 = vsel %vm1904_vm15, %v1142_v56, %v1455_v51  ;;  %v1223_v2 = vsel %vm1910_vm0, %v1143_v57, %v1457_v52  ;;  %v1150_v3 = vor.u32 %v1148_v60, %v1147_v59  ;;  %v1151_v4 = vrot.slane %v1147_v59, 4 }
 0x1a9   : > { %1456 = vst [vmem:[%s1795_s21 + $0x18] sm:$0xf] %v1220_v34  ;;  %1458 = vst [vmem:[%s1795_s21 + $0x1c] sm:$0x1] %v1223_v2  ;;  %v1171_v5 = vrot.slane %v1169_v61, 7  ;;  %v1177_v33 = vshrl.u32 %v1488_v0, 16 }
 0x1aa   : > { %v1226_v9 = vsel %vm1904_vm15, %v1150_v3, %v1459_v62  ;;  %v1229_v10 = vsel %vm1910_vm0, %v1151_v4, %v1461_v63  ;;  %v1180_v14 = vshll.u32 %v1488_v0, 16 }
 0x1ab   : > { %v1174_v11 = vor.u32 %v1172_v6, %v1171_v5  ;;  %v1175_v12 = vrot.slane %v1171_v5, 4  ;;  %1460 = vst [vmem:[%s1795_s21 + $0x20] sm:$0xf] %v1226_v9  ;;  %1462 = vst [vmem:[%s1795_s21 + $0x24] sm:$0x1] %v1229_v10  ;;  %v1179_v13 = vrot.slane %v1177_v33, 7 }
 0x1ad   : > { %v1244_v17 = vsel %vm1904_vm15, %v1174_v11, %v1471_v7  ;;  %v1247_v18 = vsel %vm1910_vm0, %v1175_v12, %v1473_v8  ;;  %v1182_v19 = vor.u32 %v1180_v14, %v1179_v13  ;;  %v1183_v1 = vrot.slane %v1179_v13, 4 }
 0x1ae   : > { %1472 = vst [vmem:[%s1795_s21 + $0x38] sm:$0xf] %v1244_v17  ;;  %1474 = vst [vmem:[%s1795_s21 + $0x3c] sm:$0x1] %v1247_v18 }
 0x1af   : > { %v1250_v20 = vsel %vm1904_vm15, %v1182_v19, %v1475_v15  ;;  %v1253_v21 = vsel %vm1910_vm0, %v1183_v1, %v1477_v16 }
 0x1b0   : > { %1476 = vst [vmem:[%s1795_s21 + $0x40] sm:$0xf] %v1250_v20  ;;  %1478 = vst [vmem:[%s1795_s21 + $0x44] sm:$0x1] %v1253_v21 }
 0x1b1 PF: > { %s13_s12 = sadd.s32 1, %s1564_s12  }
 0x1b2   : > { %p10_p4 = scmp.ge.s32.totalorder %s13_s12, 4  }
 0x1b4   :  { %12 = sbr.rel (!%p10_p4) target bundleno = 1 (0x1), region = 68 }

// kernel: basic_block_forward.3
= control target key start
LH: loop header
LB: loop body
LE: loop exit
PB: predicated region body
PF: predicated region fallthrough
CT: control target
= control target key end

     0   :  { %s2917_s18 = smov 0   ;;  %s3449_s0 = inlined_call_operand.vmem [shape: bf16[2,10,10,128], index: 0, kind: input, shape index: {}]   ;;  %s3450_s1 = inlined_call_operand.vmem [shape: bf16[1152,128], index: 1, kind: input, shape index: {}]   ;;  %s3451_s2 = inlined_call_operand.vmem [shape: f32[1,128], index: 2, kind: input, shape index: {}]   ;;  %s3452_s3 = inlined_call_operand.vmem [shape: bf16[2,8,8,16], index: 3, kind: input, shape index: {}]   ;;  %s3453_s4 = inlined_call_operand.vmem [shape: bf16[16,128], index: 4, kind: input, shape index: {}]   ;;  %s3454_s5 = inlined_call_operand.vmem [shape: bf16[2,8,8,128], index: 5, kind: output, shape index: {}]  }
   0x1 LB: > { %s2239_s19 = sadd.s32 4294967295, %s2885_s18   ;;  %p2243_p0 = scmp.ge.s32.totalorder %s2885_s18, 1  ;;  %s2885_s18 = sphi %s2917_s18, %s15_s18  }
   0x2   : > { %p197_p1 = scmp.lt.s32.totalorder %s2885_s18, 3 }
   0x4   : > { %p198_p2 = pnand %p2243_p0, %p197_p1 }
   0x5   : > { %v2790_v0 = vld [vmem:[%s3450_s1 + $0x40] sm:$0xff] (!%p198_p2)   ;;  %p230_p3 = scmp.lt.s32.totalorder (!%p198_p2), %s2239_s19, 1  ;;  %v2793_v3 = vld [vmem:[%s3450_s1 + $0x48] sm:$0xff] (!%p198_p2)   ;;  %vm1274_vm0 = vcmask (!%p198_p2), 130048   ;;  %v2799_v9 = vld [vmem:[%s3450_s1 + $0x50] sm:$0xff] (!%p198_p2)   ;;  %vm465_vm1 = vcmask (!%p198_p2), 1042432  }
   0x6   : > { %201 = sbr.rel (%p198_p2) target bundleno = 347 (0x15b), region = 40  ;;  %v2791_v1 = vld [vmem:[%s3450_s1] sm:$0xff] (!%p198_p2)   ;;  %2519 = vmatprep.subr.bf16.mxu1 (!%p198_p2), %v2790_v0  ;;  %v2794_v4 = vld [vmem:[%s3450_s1 + $0x8] sm:$0xff] (!%p198_p2)   ;;  %v2800_v10 = vld [vmem:[%s3450_s1 + $0x10] sm:$0xff] (!%p198_p2)   ;;  %vm466_vm2 = vcmask (!%p198_p2), 1046532  }
   0x7   : > { %v2792_v2 = vld [vmem:[%s3453_s4] sm:$0xff] (!%p198_p2)   ;;  %2520 = vmatpush3.bf16.msra.mxu1 (!%p198_p2), %v2791_v1  ;;  %v2801_v11 = vld [vmem:[%s3450_s1 + $0xc8] sm:$0xff] (!%p198_p2)   ;;  %v2803_v13 = vld [vmem:[%s3450_s1 + $0x58] sm:$0xff] (!%p198_p2)   ;;  %vm298_vm3 = vsmask.f32 (!%p198_p2), 3328 }
   0x8   : > { %2691 = vmatprep.subr.bf16.mxu0 (!%p198_p2), %v2792_v2  ;;  %2521 = vmatprep.subr.bf16.mxu1 (!%p198_p2), %v2793_v3  ;;  %v2796_v5 = vld [vmem:[%s3450_s1 + $0xc0] sm:$0xff] (!%p198_p2)   ;;  %v2802_v12 = vld [vmem:[%s3450_s1 + $0x88] sm:$0xff] (!%p198_p2)   ;;  %v2804_v14 = vld [vmem:[%s3450_s1 + $0x18] sm:$0xff] (!%p198_p2)   ;;  %vm299_vm4 = vsmask.f32 (!%p198_p2), 7440 }
   0x9   : > { %2692 = vmatpush3.bf16.msra.mxu0 (!%p198_p2), %v2792_v2  ;;  %v2798_v6 = vld [vmem:[%s3450_s1 + $0x80] sm:$0xff] (!%p198_p2)   ;;  %v2805_v15 = vld [vmem:[%s3450_s1 + $0xd0] sm:$0xff] (!%p198_p2)   ;;  %v2809_v19 = vld [vmem:[%s3450_s1 + $0xd8] sm:$0xff] (!%p198_p2)  }
   0xa   : > { %2559 = vmatprep.subr.bf16.mxu0 (!%p198_p2), %v2796_v5  ;;  %v2806_v16 = vld [vmem:[%s3450_s1 + $0x90] sm:$0xff] (!%p198_p2)   ;;  %v2807_v17 = vld [vmem:[%s3450_s1 + $0x60] sm:$0xff] (!%p198_p2)   ;;  %v2810_v20 = vld [vmem:[%s3450_s1 + $0x98] sm:$0xff] (!%p198_p2)  }
   0xb   : > { %2522 = vmatpush3.bf16.msra.mxu1 (!%p198_p2), %v2794_v4  ;;  %v2808_v18 = vld [vmem:[%s3450_s1 + $0x20] sm:$0xff] (!%p198_p2)   ;;  %v2811_v21 = vld [vmem:[%s3450_s1 + $0x68] sm:$0xff] (!%p198_p2)   ;;  %v2815_v25 = vld [vmem:[%s3450_s1 + $0x70] sm:$0xff] (!%p198_p2)  }
   0xc   : > { %2523 = vmatprep.subr.bf16.mxu1 (!%p198_p2), %v2799_v9  ;;  %v2812_v22 = vld [vmem:[%s3450_s1 + $0x28] sm:$0xff] (!%p198_p2)   ;;  %v2813_v23 = vld [vmem:[%s3450_s1 + $0xe0] sm:$0xff] (!%p198_p2)   ;;  %v2816_v26 = vld [vmem:[%s3450_s1 + $0x30] sm:$0xff] (!%p198_p2)  }
   0xd   : > { %s3460_s19 = smov (!%p230_p3, %s2239_s19), 1  ;;  %v2814_v24 = vld [vmem:[%s3450_s1 + $0xa0] sm:$0xff]   ;;  %v2817_v27 = vld [vmem:[%s3450_s1 + $0xe8] sm:$0xff]   ;;  %v2821_v31 = vld [vmem:[%s3450_s1 + $0x78] sm:$0xff]  }
   0xe   : > { %s2481_s30 = sshll.u32 %s3460_s19, 5  ;;  %s2781_s6 = smul.u32 80, %s3460_s19  ;;  %v2819_v29 = vld [vmem:[%s3450_s1 + $0xa8] sm:$0xff]   ;;  %v2822_v32 = vld [vmem:[%s3450_s1 + $0x38] sm:$0xff]   ;;  %v2823_v33 = vld [vmem:[%s3450_s1 + $0xf0] sm:$0xff]  }
   0xf   : > { %s2951_s10 = scalar_lea.vmem %s3452_s3, %s2481_s30  ;;  %2524 = vmatpush3.bf16.msra.mxu1 %v2800_v10  ;;  %v2824_v44 = vld [vmem:[%s3450_s1 + $0xb0] sm:$0xff]   ;;  %v2826_v45 = vld [vmem:[%s3450_s1 + $0x140] sm:$0xff]   ;;  %vm3051_vm5 = vmor %vm465_vm1, %vm466_vm2  ;;  %s244_s27 = scalar_lea.vmem %s3454_s5, %s2481_s30 }
  0x10   : > { %v2795_v7 = vld [vmem:[%s2951_s10] sm:$0xff]   ;;  %v2797_v8 = vld [vmem:[%s2951_s10 + $0x8] sm:$0xff]   ;;  %2525 = vmatprep.subr.bf16.mxu1 %v2803_v13  ;;  %v2818_v28 = vld [vmem:[%s2951_s10 + $0x10] sm:$0xff]   ;;  %s3027_s14 = scalar_lea.vmem %s3449_s0, %s2781_s6 }
  0x11   : > { %2693 = vmatprep.mubr.msk.bf16.mxu0 %vm1274_vm0, %v2795_v7  ;;  %v2820_v30 = vld [vmem:[%s2951_s10 + $0x18] sm:$0xff]   ;;  %v282_v34 = vld [vmem:[%s3027_s14] sm:$0xf]  ;;  %v283_v35 = vld [vmem:[%s3027_s14 + $0x4] sm:$0x1] }
  0x12   : > { %2694 = vmatmul.mubr.msk.bf16.vlgmr.msra.gmra.mrb[0].mxu0 %vm1274_vm0, %v2797_v8  ;;  %v284_v36 = vld [vmem:[%s3027_s14 + $0x8] sm:$0xf]  ;;  %v285_v37 = vld [vmem:[%s3027_s14 + $0xc] sm:$0x1]  ;;  %v302_v38 = vshrl.u32 %v282_v34, 16  ;;  %v305_v39 = vshll.u32 %v282_v34, 16  ;;  %vm3057_vm6 = vmor %vm298_vm3, %vm299_vm4 }
  0x13   : > { %2560 = vmatpush3.bf16.msra.mxu0 %v2798_v6  ;;  %2526 = vmatpush3.bf16.msra.mxu1 %v2804_v14  ;;  %v311_v40 = vshll.u32 %v283_v35, 16  ;;  %v316_v41 = vshrl.u32 %v284_v36, 16  ;;  %v319_v42 = vshll.u32 %v284_v36, 16  ;;  %v325_v43 = vshll.u32 %v285_v37, 16  ;;  %v2828_v57 = vld [vmem:[%s3450_s1 + $0xf8] sm:$0xff]   ;;  %v2827_v62 = vld [vmem:[%s3450_s1 + $0x100] sm:$0xff]  }
  0x14   : > { %2561 = vmatprep.subr.bf16.mxu0 %v2801_v11  ;;  %2527 = vmatprep.subr.bf16.mxu1 %v2807_v17  ;;  %v304_v46 = vrot.slane %v302_v38, 4  ;;  %v307_v47 = vrot.slane %v305_v39, 5  ;;  %v2825_v59 = vld [vmem:[%s3027_s14] ss:$8 sps:$4 sm:$0xff]   ;;  %v2829_v60 = vld [vmem:[%s3450_s1 + $0xb8] sm:$0xff]  }
  0x15   : > { %2697 = vmatprep.mubr.msk.bf16.mxu0 %vm1274_vm0, %v2818_v28  ;;  %v318_v48 = vrot.slane %v316_v41, 4  ;;  %v313_v49 = vrot.slane %v311_v40, 5  ;;  %v321_v50 = vrot.slane %v319_v42, 5  ;;  %v327_v55 = vrot.slane %v325_v43, 5  ;;  %v2831_v0 = vld [vmem:[%s3027_s14 + $0x8] ss:$8 sps:$4 sm:$0xff]  }
  0x16   : > { %v308_v52 = vor.u32 %v307_v47, %v304_v46  ;;  %v2830_v2 = vld [vmem:[%s3450_s1 + $0x148] sm:$0xff]   ;;  %v433_v3 = vld [vmem:[%s3027_s14] sm:$0xe]  ;;  %v434_v4 = vld [vmem:[%s3027_s14 + $0x4] sm:$0x1] }
  0x17   : > { %2562 = vmatpush3.bf16.msra.mxu0 %v2802_v12  ;;  %2528 = vmatpush3.bf16.msra.mxu1 %v2808_v18  ;;  %v322_v54 = vor.u32 %v321_v50, %v318_v48  ;;  %v435_v5 = vld [vmem:[%s3027_s14 + $0x8] sm:$0xe]  ;;  %v436_v6 = vld [vmem:[%s3027_s14 + $0xc] sm:$0x1]  ;;  %v2257_v8 = vrot.slane %v433_v3, 9  ;;  %v470_v9 = vrot.slane %v434_v4, 5 }
  0x18   : > { %2563 = vmatprep.subr.bf16.mxu0 %v2805_v15  ;;  %2529 = vmatprep.subr.bf16.mxu1 %v2811_v21  ;;  %v309_v56 = vrot.slane %v308_v52, 4  ;;  %v2832_v7 = vld [vmem:[%s3450_s1 + $0x108] sm:$0xff]   ;;  %v2258_v10 = vrot.slane %v435_v5, 9  ;;  %v474_v11 = vrot.slane %v436_v6, 5  ;;  %v2833_v12 = vld [vmem:[%s3450_s1 + $0x1c0] sm:$0xff]   ;;  %v2840_v42 = vld [vmem:[%s3450_s1 + $0x158] sm:$0xff]  }
  0x19   : > { %v323_v58 = vrot.slane %v322_v54, 4  ;;  %v286_v13 = vld [vmem:[%s3027_s14 + $0x10] sm:$0xf]  ;;  %v471_v14 = vsel %vm3051_vm5, %v2257_v8, %v470_v9  ;;  %v288_v17 = vld [vmem:[%s3027_s14 + $0x18] sm:$0xf]  ;;  %v2839_v39 = vld [vmem:[%s3450_s1 + $0x188] sm:$0xff]  }
  0x1a   : > { %2698 = vmatmul.mubr.msk.bf16.gmra.mrb[4].mxu0 %vm1274_vm0, %v2820_v30  ;;  %v314_v61 = vsel %vm3057_vm6, %v309_v56, %v313_v49  ;;  %v475_v15 = vsel %vm3051_vm5, %v2258_v10, %v474_v11  ;;  %v289_v18 = vld [vmem:[%s3027_s14 + $0x1c] sm:$0x1]  ;;  %v333_v21 = vshll.u32 %v286_v13, 16  ;;  %v2835_v41 = vld [vmem:[%s3027_s14 + $0x10] ss:$8 sps:$4 sm:$0xff]   ;;  %v2846_v11 = vld [vmem:[%s3450_s1 + $0x160] sm:$0xff]  }
  0x1b   : > { %2564 = vmatpush3.bf16.msra.mxu0 %v2806_v16  ;;  %2530 = vmatpush3.bf16.msra.mxu1 %v2812_v22  ;;  %v328_v63 = vsel %vm3057_vm6, %v323_v58, %v327_v55  ;;  %v287_v16 = vld [vmem:[%s3027_s14 + $0x14] sm:$0x1]  ;;  %v2842_v47 = vld [vmem:[%s3450_s1 + $0x118] sm:$0xff]   ;;  %v437_v48 = vld [vmem:[%s3027_s14 + $0x10] sm:$0xe] }
  0x1c   : > { %2565 = vmatprep.subr.bf16.mxu0 %v2809_v19  ;;  %2531 = vmatprep.subr.bf16.mxu1 %v2815_v25  ;;  %v2253_v1 = vcombine.low %v314_v61, %v328_v63  ;;  %v2265_v19 = vcombine.low %v471_v14, %v475_v15  ;;  %v339_v22 = vshll.u32 %v287_v16, 16  ;;  %v347_v25 = vshll.u32 %v288_v17, 16  ;;  %v438_v49 = vld [vmem:[%s3027_s14 + $0x14] sm:$0x1]  ;;  %v439_v50 = vld [vmem:[%s3027_s14 + $0x18] sm:$0xe] }
  0x1d   : > { %1881 = vmatprep.mubr.bf16.mxu0 %v2831_v0  ;;  %v440_v52 = vld [vmem:[%s3027_s14 + $0x1c] sm:$0x1]  ;;  %v2259_v54 = vrot.slane %v437_v48, 9  ;;  %v478_v55 = vrot.slane %v438_v49, 5  ;;  %v2260_v56 = vrot.slane %v439_v50, 9  ;;  %v2847_v14 = vld [vmem:[%s3450_s1 + $0x120] sm:$0xff]  }
  0x1e   : > { %1816 = vmatprep.mubr.bf16.mxu1 %v2253_v1  ;;  %v341_v35 = vrot.slane %v339_v22, 5  ;;  %v291_v61 = vld [vmem:[%s3027_s14 + $0x24] sm:$0x1]  ;;  %v292_v63 = vld [vmem:[%s3027_s14 + $0x28] sm:$0xf]  ;;  %v2856_v49 = vld [vmem:[%s3450_s1 + $0x170] sm:$0xff]  }
  0x1f   : > { %2566 = vmatpush3.bf16.msra.mxu0 %v2810_v20  ;;  %2532 = vmatpush3.bf16.msra.mxu1 %v2816_v26  ;;  %v330_v20 = vshrl.u32 %v286_v13, 16  ;;  %v353_v26 = vshll.u32 %v289_v18, 16  ;;  %v479_v58 = vsel %vm3051_vm5, %v2259_v54, %v478_v55  ;;  %v293_v0 = vld [vmem:[%s3027_s14 + $0x2c] sm:$0x1]  ;;  %v367_v4 = vshll.u32 %v291_v61, 16  ;;  %v2848_v18 = vld [vmem:[%s3450_s1 + $0x1d8] sm:$0xff]  }
  0x20   : > { %2567 = vmatprep.subr.bf16.mxu0 %v2813_v23  ;;  %2533 = vmatprep.subr.bf16.mxu1 %v2821_v31  ;;  %v2834_v23 = vld [vmem:[%s3450_s1 + $0x180] sm:$0xff]   ;;  %v349_v31 = vrot.slane %v347_v25, 5  ;;  %v372_v5 = vshrl.u32 %v292_v63, 16  ;;  %v375_v6 = vshll.u32 %v292_v63, 16  ;;  %v381_v10 = vshll.u32 %v293_v0, 16 }
  0x21   : > { %v332_v28 = vrot.slane %v330_v20, 4  ;;  %v355_v36 = vrot.slane %v353_v26, 5  ;;  %v369_v16 = vrot.slane %v367_v4, 5  ;;  %v2860_v4 = vld [vmem:[%s3450_s1 + $0x178] sm:$0xff]  }
  0x22   : > { %v377_v13 = vrot.slane %v375_v6, 5  ;;  %v2855_v6 = vld [vmem:[%s3027_s14 + $0x30] ss:$8 sps:$4 sm:$0xff]  }
  0x23   : > { %2568 = vmatpush3.bf16.msra.mxu0 %v2814_v24  ;;  %2534 = vmatpush3.bf16.msra.mxu1 %v2822_v32  ;;  %v344_v24 = vshrl.u32 %v288_v17, 16  ;;  %v2837_v32 = vld [vmem:[%s3450_s1 + $0x110] sm:$0xff]   ;;  %v383_v17 = vrot.slane %v381_v10, 5  ;;  %v2861_v10 = vld [vmem:[%s3027_s14 + $0x38] ss:$8 sps:$4 sm:$0xff]  }
  0x24   : > { %2569 = vmatprep.subr.bf16.mxu0 %v2817_v27  ;;  %2599 = vmatprep.subr.bf16.mxu1 %v2826_v45  ;;  %v2836_v27 = vld [vmem:[%s3450_s1 + $0x150] sm:$0xff]   ;;  %v2841_v45 = vld [vmem:[%s3027_s14 + $0x18] ss:$8 sps:$4 sm:$0xff]  }
  0x25   : > { %v346_v30 = vrot.slane %v344_v24, 4  ;;  %v2850_v24 = vld [vmem:[%s3450_s1 + $0x168] sm:$0xff]  }
  0x26   : > { %1817 = vmatmul.mubr.bf16.vlgmr.msra.gmra.mrb[0].mxu1 %v2825_v59  ;;  %v2843_v59 = vld [vmem:[%s3450_s1 + $0x1d0] sm:$0xff]  }
  0x27   : > { %2570 = vmatpush3.bf16.msra.mxu0 %v2819_v29  ;;  %2600 = vmatpush3.bf16.msra.mxu1 %v2827_v62  ;;  %v335_v29 = vrot.slane %v333_v21, 5  ;;  %v350_v37 = vor.u32 %v349_v31, %v346_v30  ;;  %v2849_v21 = vld [vmem:[%s3450_s1 + $0x198] sm:$0xff]   ;;  %v441_v30 = vld [vmem:[%s3027_s14 + $0x20] sm:$0xe]  ;;  %v442_v31 = vld [vmem:[%s3027_s14 + $0x24] sm:$0x1] }
  0x28   : > { %2571 = vmatprep.subr.bf16.mxu0 %v2823_v33  ;;  %2601 = vmatprep.subr.bf16.mxu1 %v2830_v2  ;;  %v2838_v33 = vld [vmem:[%s3450_s1 + $0x1c8] sm:$0xff]  }
  0x29   : > { %v336_v34 = vor.u32 %v335_v29, %v332_v28  ;;  %v351_v40 = vrot.slane %v350_v37, 4  ;;  %v2852_v29 = vld [vmem:[%s3450_s1 + $0x128] sm:$0xff]   ;;  %v2853_v37 = vld [vmem:[%s3450_s1 + $0x1e0] sm:$0xff]  }
  0x2b   : > { %2572 = vmatpush3.bf16.msra.mxu0 %v2824_v44  ;;  %2602 = vmatpush3.bf16.msra.mxu1 %v2832_v7  ;;  %v337_v38 = vrot.slane %v336_v34, 4  ;;  %v356_v44 = vsel %vm3057_vm6, %v351_v40, %v355_v36  ;;  %v2844_v7 = vld [vmem:[%s3450_s1 + $0x190] sm:$0xff]   ;;  %v2261_v34 = vrot.slane %v441_v30, 9 }
  0x2c   : > { %2573 = vmatprep.subr.bf16.mxu0 %v2828_v57  ;;  %2603 = vmatprep.subr.bf16.mxu1 %v2836_v27  ;;  %v482_v57 = vrot.slane %v440_v52, 5  ;;  %v2851_v27 = vld [vmem:[%s3027_s14 + $0x28] ss:$8 sps:$4 sm:$0xff]  }
  0x2d   : > { %v342_v43 = vsel %vm3057_vm6, %v337_v38, %v341_v35  ;;  %v486_v35 = vrot.slane %v442_v31, 5 }
  0x2e   : > { %v2254_v46 = vcombine.low %v342_v43, %v356_v44  ;;  %v483_v62 = vsel %vm3051_vm5, %v2260_v56, %v482_v57  ;;  %v296_v43 = vld [vmem:[%s3027_s14 + $0x38] sm:$0xf]  ;;  %v2857_v56 = vld [vmem:[%s3450_s1 + $0x130] sm:$0xff]  }
  0x2f   : > { %2574 = vmatpush3.bf16.msra.mxu0 %v2829_v60  ;;  %2604 = vmatpush3.bf16.msra.mxu1 %v2837_v32  ;;  %v290_v60 = vld [vmem:[%s3027_s14 + $0x20] sm:$0xf]  ;;  %v2266_v3 = vcombine.low %v479_v58, %v483_v62  ;;  %v443_v32 = vld [vmem:[%s3027_s14 + $0x28] sm:$0xe]  ;;  %v487_v40 = vsel %vm3051_vm5, %v2261_v34, %v486_v35  ;;  %v400_v52 = vshrl.u32 %v296_v43, 16  ;;  %v403_v54 = vshll.u32 %v296_v43, 16 }
  0x30   : > { %2639 = vmatprep.subr.bf16.mxu0 %v2833_v12  ;;  %2605 = vmatprep.subr.bf16.mxu1 %v2840_v42  ;;  %v358_v1 = vshrl.u32 %v290_v60, 16  ;;  %v361_v2 = vshll.u32 %v290_v60, 16  ;;  %v374_v12 = vrot.slane %v372_v5, 4  ;;  %v2262_v36 = vrot.slane %v443_v32, 9  ;;  %v295_v42 = vld [vmem:[%s3027_s14 + $0x34] sm:$0x1] }
  0x31   : > { %1824 = vmatprep.mubr.bf16.mxu1 %v2254_v46  ;;  %v395_v48 = vshll.u32 %v295_v42, 16  ;;  %v402_v60 = vrot.slane %v400_v52, 4  ;;  %v405_v61 = vrot.slane %v403_v54, 5  ;;  %v2859_v62 = vld [vmem:[%s3450_s1 + $0x1a8] sm:$0xff]   ;;  %v2867_v54 = vld [vmem:[%s3450_s1 + $0x1b8] sm:$0xff]  }
  0x32   : > { %1882 = vmatmul.mubr.bf16.vlgmr.msra.gmra.mrb[8].mxu0 %v2265_v19  ;;  %1825 = vmatmul.mubr.bf16.gmra.mrb[4].mxu1 %v2835_v41  ;;  %v360_v8 = vrot.slane %v358_v1, 4  ;;  %v363_v9 = vrot.slane %v361_v2, 5  ;;  %v378_v19 = vor.u32 %v377_v13, %v374_v12  ;;  %v294_v41 = vld [vmem:[%s3027_s14 + $0x30] sm:$0xf]  ;;  %v446_v13 = vld [vmem:[%s3027_s14 + $0x34] sm:$0x1] }
  0x33   : > { %2640 = vmatpush3.bf16.msra.mxu0 %v2834_v23  ;;  %1889 = vmatprep.mubr.bf16.mxu0 %v2841_v45  ;;  %v2845_v23 = vld [vmem:[%s3027_s14 + $0x20] ss:$8 sps:$4 sm:$0xff]   ;;  %v297_v45 = vld [vmem:[%s3027_s14 + $0x3c] sm:$0x1]  ;;  %v386_v46 = vshrl.u32 %v294_v41, 16  ;;  %v397_v0 = vrot.slane %v395_v48, 5  ;;  %v406_v2 = vor.u32 %v405_v61, %v402_v60 }
  0x34   : > { %2641 = vmatprep.subr.bf16.mxu0 %v2838_v33  ;;  %2606 = vmatpush3.bf16.msra.mxu1 %v2842_v47  ;;  %v364_v15 = vor.u32 %v363_v9, %v360_v8  ;;  %v379_v22 = vrot.slane %v378_v19, 4  ;;  %v444_v33 = vld [vmem:[%s3027_s14 + $0x2c] sm:$0x1]  ;;  %v389_v47 = vshll.u32 %v294_v41, 16  ;;  %v409_v55 = vshll.u32 %v297_v45, 16  ;;  %v3237_v45 = vld [vmem:[%s3450_s1 + $0x200] sm:$0xff]  }
  0x35   : > { %2607 = vmatprep.subr.bf16.mxu1 %v2846_v11  ;;  %v490_v38 = vrot.slane %v444_v33, 5  ;;  %v388_v57 = vrot.slane %v386_v46, 4  ;;  %v407_v5 = vrot.slane %v406_v2, 4  ;;  %v445_v12 = vld [vmem:[%s3027_s14 + $0x30] sm:$0xe] }
  0x36   : > { %v365_v20 = vrot.slane %v364_v15, 4  ;;  %v384_v26 = vsel %vm3057_vm6, %v379_v22, %v383_v17  ;;  %v391_v58 = vrot.slane %v389_v47, 5  ;;  %v411_v1 = vrot.slane %v409_v55, 5  ;;  %v448_v15 = vld [vmem:[%s3027_s14 + $0x3c] sm:$0x1]  ;;  %v2864_v33 = vld [vmem:[%s3450_s1 + $0x1b0] sm:$0xff]  }
  0x37   : > { %2642 = vmatpush3.bf16.msra.mxu0 %v2839_v39  ;;  %v2854_v39 = vld [vmem:[%s3450_s1 + $0x1a0] sm:$0xff]   ;;  %v491_v44 = vsel %vm3051_vm5, %v2262_v36, %v490_v38  ;;  %v494_v17 = vrot.slane %v446_v13, 5  ;;  %v498_v19 = vrot.slane %v448_v15, 5  ;;  %v2301_v22 = vld [vmem:[%s3027_s14 + $0x8] sm:$0xe] }
  0x38   : > { %2643 = vmatprep.subr.bf16.mxu0 %v2843_v59  ;;  %2608 = vmatpush3.bf16.msra.mxu1 %v2847_v14  ;;  %v370_v25 = vsel %vm3057_vm6, %v365_v20, %v369_v16  ;;  %v2267_v50 = vcombine.low %v487_v40, %v491_v44  ;;  %v2858_v59 = vld [vmem:[%s3450_s1 + $0x1e8] sm:$0xff]   ;;  %v392_v63 = vor.u32 %v391_v58, %v388_v57  ;;  %v447_v14 = vld [vmem:[%s3027_s14 + $0x38] sm:$0xe]  ;;  %v2263_v16 = vrot.slane %v445_v12, 9  ;;  %v2284_v38 = vld [vmem:[%s3027_s14 + $0x14] sm:$0x1] }
  0x39   : > { %2609 = vmatprep.subr.bf16.mxu1 %v2850_v24  ;;  %v2255_v28 = vcombine.low %v370_v25, %v384_v26  ;;  %v412_v9 = vsel %vm3057_vm6, %v407_v5, %v411_v1  ;;  %v2303_v25 = vld [vmem:[%s3027_s14 + $0x10] sm:$0xe]  ;;  %v2304_v26 = vld [vmem:[%s3027_s14 + $0x14] sm:$0x1]  ;;  %v2281_v34 = vld [vmem:[%s3027_s14 + $0x8] sm:$0xf] }
  0x3a   : > { %1890 = vmatmul.mubr.bf16.gmra.mrb[12].mxu0 %v2266_v3  ;;  %v393_v3 = vrot.slane %v392_v63, 4  ;;  %v495_v20 = vsel %vm3051_vm5, %v2263_v16, %v494_v17  ;;  %v2318_v30 = vrot.slane %v2303_v25, 9  ;;  %v743_v31 = vrot.slane %v2304_v26, 5  ;;  %v2282_v35 = vld [vmem:[%s3027_s14 + $0xc] sm:$0x1] }
  0x3b   : > { %2644 = vmatpush3.bf16.msra.mxu0 %v2844_v7  ;;  %1897 = vmatprep.mubr.bf16.mxu0 %v2851_v27  ;;  %v2862_v7 = vld [vmem:[%s3450_s1 + $0x138] sm:$0xff]   ;;  %v2317_v27 = vrot.slane %v2301_v22, 9  ;;  %v577_v40 = vshll.u32 %v2281_v34, 16  ;;  %v583_v42 = vshll.u32 %v2282_v35, 16  ;;  %v597_v48 = vshll.u32 %v2284_v38, 16 }
  0x3c   : > { %2645 = vmatprep.subr.bf16.mxu0 %v2848_v18  ;;  %1832 = vmatprep.mubr.bf16.mxu1 %v2255_v28  ;;  %v398_v8 = vsel %vm3057_vm6, %v393_v3, %v397_v0  ;;  %v2264_v18 = vrot.slane %v447_v14, 9  ;;  %v744_v36 = vsel %vm3051_vm5, %v2318_v30, %v743_v31  ;;  %v2341_v60 = vld [vmem:[%s3027_s14 + $0x10] sm:$0xf]  ;;  %v2342_v61 = vld [vmem:[%s3027_s14 + $0x14] sm:$0x1] }
  0x3d   : > { %2610 = vmatpush3.bf16.msra.mxu1 %v2852_v29  ;;  %v2256_v11 = vcombine.low %v398_v8, %v412_v9  ;;  %v579_v47 = vrot.slane %v577_v40, 5  ;;  %v599_v57 = vrot.slane %v597_v48, 5  ;;  %v2343_v63 = vld [vmem:[%s3027_s14 + $0x18] sm:$0xf]  ;;  %v2344_v0 = vld [vmem:[%s3027_s14 + $0x1c] sm:$0x1] }
  0x3e   : > { %1833 = vmatmul.mubr.bf16.gmra.mrb[8].mxu1 %v2845_v23  ;;  %2611 = vmatprep.subr.bf16.mxu1 %v2856_v49  ;;  %v2302_v23 = vld [vmem:[%s3027_s14 + $0xc] sm:$0x1]  ;;  %v499_v24 = vsel %vm3051_vm5, %v2264_v18, %v498_v19  ;;  %v2866_v49 = vld [vmem:[%s3450_s1 + $0x1f8] sm:$0xff]   ;;  %v843_v1 = vshrl.u32 %v2341_v60, 16  ;;  %v846_v3 = vshll.u32 %v2341_v60, 16  ;;  %v857_v5 = vshrl.u32 %v2343_v63, 16 }
  0x3f   : > { %2646 = vmatpush3.bf16.msra.mxu0 %v2849_v21  ;;  %1840 = vmatprep.mubr.bf16.mxu1 %v2256_v11  ;;  %v2863_v21 = vld [vmem:[%s3450_s1 + $0x1f0] sm:$0xff]   ;;  %v739_v28 = vrot.slane %v2302_v23, 5  ;;  %v2268_v29 = vcombine.low %v495_v20, %v499_v24  ;;  %v860_v8 = vshll.u32 %v2343_v63, 16  ;;  %v866_v9 = vshll.u32 %v2344_v0, 16  ;;  %v3258_v11 = vld [vmem:[%s3450_s1 + $0x208] sm:$0xff]  }
  0x40   : > { %2647 = vmatprep.subr.bf16.mxu0 %v2853_v37  ;;  %v2283_v37 = vld [vmem:[%s3027_s14 + $0x10] sm:$0xf]  ;;  %v848_v12 = vrot.slane %v846_v3, 5  ;;  %v859_v14 = vrot.slane %v857_v5, 4  ;;  %v2305_v17 = vld [vmem:[%s3027_s14 + $0x18] sm:$0xe] }
  0x41   : > { %2612 = vmatpush3.bf16.msra.mxu1 %v2857_v56  ;;  %v740_v32 = vsel %vm3051_vm5, %v2317_v27, %v739_v28  ;;  %v588_v43 = vshrl.u32 %v2283_v37, 16  ;;  %v591_v44 = vshll.u32 %v2283_v37, 16  ;;  %v585_v56 = vrot.slane %v583_v42, 5  ;;  %v2306_v18 = vld [vmem:[%s3027_s14 + $0x1c] sm:$0x1]  ;;  %v3267_v24 = vld [vmem:[%s3450_s1 + $0x210] sm:$0xff]  }
  0x42   : > { %1898 = vmatmul.mubr.bf16.gmra.mrb[16].mxu0 %v2267_v50  ;;  %2613 = vmatprep.subr.bf16.mxu1 %v2860_v4  ;;  %v2325_v41 = vcombine.low %v740_v32, %v744_v36  ;;  %v852_v4 = vshll.u32 %v2342_v61, 16  ;;  %v862_v15 = vrot.slane %v860_v8, 5  ;;  %v868_v16 = vrot.slane %v866_v9, 5  ;;  %v2307_v20 = vld [vmem:[%s3027_s14 + $0x20] sm:$0xe] }
  0x43   : > { %2648 = vmatpush3.bf16.msra.mxu0 %v2854_v39  ;;  %1905 = vmatprep.mubr.bf16.mxu0 %v2861_v10  ;;  %v574_v39 = vshrl.u32 %v2281_v34, 16  ;;  %v590_v50 = vrot.slane %v588_v43, 4  ;;  %v593_v52 = vrot.slane %v591_v44, 5  ;;  %v2319_v22 = vrot.slane %v2305_v17, 9  ;;  %v2285_v28 = vld [vmem:[%s3027_s14 + $0x18] sm:$0xf] }
  0x44   : > { %2649 = vmatprep.subr.bf16.mxu0 %v2858_v59  ;;  %v854_v13 = vrot.slane %v852_v4, 5  ;;  %v747_v23 = vrot.slane %v2306_v18, 5  ;;  %v863_v25 = vor.u32 %v862_v15, %v859_v14  ;;  %v2320_v26 = vrot.slane %v2307_v20, 9  ;;  %v2287_v32 = vld [vmem:[%s3027_s14 + $0x20] sm:$0xf] }
  0x45   : > { %2614 = vmatpush3.bf16.msra.mxu1 %v2862_v7  ;;  %v576_v46 = vrot.slane %v574_v39, 4  ;;  %v594_v58 = vor.u32 %v593_v52, %v590_v50  ;;  %v845_v7 = vrot.slane %v843_v1, 4  ;;  %v602_v34 = vshrl.u32 %v2285_v28, 16  ;;  %v2869_v36 = vld [vmem:[%s3027_s14 + $0x10] ss:$8 sps:$4 sm:$0xff]  }
  0x46   : > { %1841 = vmatmul.mubr.bf16.gmra.mrb[12].mxu1 %v2855_v6  ;;  %2725 = vmatprep.subr.bf16.mxu1 %v3237_v45  ;;  %v748_v31 = vsel %vm3051_vm5, %v2319_v22, %v747_v23  ;;  %v864_v35 = vrot.slane %v863_v25, 4  ;;  %v605_v38 = vshll.u32 %v2285_v28, 16  ;;  %v616_v43 = vshrl.u32 %v2287_v32, 16  ;;  %v2348_v60 = vld [vmem:[%s3027_s14 + $0x2c] sm:$0x1] }
  0x47   : > { %2650 = vmatpush3.bf16.msra.mxu0 %v2859_v62  ;;  %1946 = vmatprep.mubr.bf16.mxu1 %v2325_v41  ;;  %v580_v55 = vor.u32 %v579_v47, %v576_v46  ;;  %v595_v62 = vrot.slane %v594_v58, 4  ;;  %v849_v19 = vor.u32 %v848_v12, %v845_v7  ;;  %v604_v42 = vrot.slane %v602_v34, 4  ;;  %v2309_v14 = vld [vmem:[%s3027_s14 + $0x28] sm:$0xe]  ;;  %v2310_v15 = vld [vmem:[%s3027_s14 + $0x2c] sm:$0x1] }
  0x48   : > { %2651 = vmatprep.subr.bf16.mxu0 %v2863_v21  ;;  %v2308_v21 = vld [vmem:[%s3027_s14 + $0x24] sm:$0x1]  ;;  %v869_v44 = vsel %vm3057_vm6, %v864_v35, %v868_v16  ;;  %v607_v46 = vrot.slane %v605_v38, 5  ;;  %v619_v48 = vshll.u32 %v2287_v32, 16  ;;  %v618_v52 = vrot.slane %v616_v43, 4 }
  0x49   : > { %v581_v59 = vrot.slane %v580_v55, 4  ;;  %v600_v6 = vsel %vm3057_vm6, %v595_v62, %v599_v57  ;;  %v751_v27 = vrot.slane %v2308_v21, 5  ;;  %v850_v30 = vrot.slane %v849_v19, 4  ;;  %v2345_v55 = vld [vmem:[%s3027_s14 + $0x20] sm:$0xf]  ;;  %v3313_v21 = vld [vmem:[%s3450_s1 + $0x228] sm:$0xff]  }
  0x4a   : > { %1906 = vmatmul.mubr.bf16.gmra.mrb[20].mxu0 %v2268_v29  ;;  %v2286_v29 = vld [vmem:[%s3027_s14 + $0x1c] sm:$0x1]  ;;  %v608_v57 = vor.u32 %v607_v46, %v604_v42  ;;  %v621_v58 = vrot.slane %v619_v48, 5  ;;  %v871_v61 = vshrl.u32 %v2345_v55, 16  ;;  %v874_v63 = vshll.u32 %v2345_v55, 16 }
  0x4b   : > { %2652 = vmatpush3.bf16.msra.mxu0 %v2864_v33  ;;  %v586_v2 = vsel %vm3057_vm6, %v581_v59, %v585_v56  ;;  %v2288_v33 = vld [vmem:[%s3027_s14 + $0x24] sm:$0x1]  ;;  %v752_v37 = vsel %vm3051_vm5, %v2320_v26, %v751_v27  ;;  %v611_v39 = vshll.u32 %v2286_v29, 16  ;;  %v855_v40 = vsel %vm3057_vm6, %v850_v30, %v854_v13  ;;  %v2347_v59 = vld [vmem:[%s3027_s14 + $0x28] sm:$0xf] }
  0x4c   : > { %2653 = vmatprep.subr.bf16.mxu0 %v2866_v49  ;;  %v2297_v10 = vcombine.low %v586_v2, %v600_v6  ;;  %v2326_v41 = vcombine.low %v748_v31, %v752_v37  ;;  %v3288_v49 = vld [vmem:[%s3450_s1 + $0x218] sm:$0xff]   ;;  %v2357_v50 = vcombine.low %v855_v40, %v869_v44  ;;  %v2346_v56 = vld [vmem:[%s3027_s14 + $0x24] sm:$0x1]  ;;  %v885_v1 = vshrl.u32 %v2347_v59, 16  ;;  %v2311_v18 = vld [vmem:[%s3027_s14 + $0x30] sm:$0xe] }
  0x4d   : > { %v613_v47 = vrot.slane %v611_v39, 5  ;;  %v880_v0 = vshll.u32 %v2346_v56, 16  ;;  %v609_v2 = vrot.slane %v608_v57, 4  ;;  %v622_v3 = vor.u32 %v621_v58, %v618_v52  ;;  %v2312_v19 = vld [vmem:[%s3027_s14 + $0x34] sm:$0x1] }
  0x4e   : > { %1947 = vmatmul.mubr.bf16.vlgmr.msra.gmra.mrb[16].mxu1 %v2297_v10  ;;  %2011 = vmatprep.mubr.bf16.mxu0 %v2357_v50  ;;  %v873_v4 = vrot.slane %v871_v61, 4  ;;  %v888_v5 = vshll.u32 %v2347_v59, 16  ;;  %v876_v6 = vrot.slane %v874_v63, 5  ;;  %v887_v8 = vrot.slane %v885_v1, 4  ;;  %v3301_v10 = vld [vmem:[%s3450_s1 + $0x220] sm:$0xff]   ;;  %v3342_v56 = vld [vmem:[%s3450_s1 + $0x230] sm:$0xff]  }
  0x4f   : > { %2654 = vmatpush3.bf16.msra.mxu0 %v2867_v54  ;;  %2733 = vmatpush3.bf16.msra.mxu1 %v3237_v45  ;;  %v625_v54 = vshll.u32 %v2288_v33, 16  ;;  %v882_v7 = vrot.slane %v880_v0, 5  ;;  %v894_v9 = vshll.u32 %v2348_v60, 16  ;;  %v614_v12 = vsel %vm3057_vm6, %v609_v2, %v613_v47  ;;  %v2289_v27 = vld [vmem:[%s3027_s14 + $0x28] sm:$0xf] }
  0x50   : > { %2701 = vmatprep.subr.bf16.mxu0 %v3237_v45  ;;  %2726 = vmatprep.subr.bf16.mxu1 %v3258_v11  ;;  %v623_v13 = vrot.slane %v622_v3, 4  ;;  %v877_v16 = vor.u32 %v876_v6, %v873_v4  ;;  %v2321_v20 = vrot.slane %v2309_v14, 9  ;;  %v755_v25 = vrot.slane %v2310_v15, 5  ;;  %v2290_v28 = vld [vmem:[%s3027_s14 + $0x2c] sm:$0x1] }
  0x51   : > { %1954 = vmatprep.mubr.bf16.mxu1 %v2326_v41  ;;  %v627_v62 = vrot.slane %v625_v54, 5  ;;  %v896_v17 = vrot.slane %v894_v9, 5  ;;  %v2322_v26 = vrot.slane %v2311_v18, 9  ;;  %v759_v31 = vrot.slane %v2312_v19, 5  ;;  %v2291_v32 = vld [vmem:[%s3027_s14 + $0x30] sm:$0xf] }
  0x52   : > { %2012 = vmatmul.mubr.bf16.vlgmr.msra.gmra.mrb[24].mxu0 %v2869_v36  ;;  %v878_v30 = vrot.slane %v877_v16, 4  ;;  %v2292_v33 = vld [vmem:[%s3027_s14 + $0x34] sm:$0x1]  ;;  %v2872_v35 = vld [vmem:[%s3027_s14 + $0x20] ss:$8 sps:$4 sm:$0xff]   ;;  %v756_v36 = vsel %vm3051_vm5, %v2321_v20, %v755_v25  ;;  %v630_v37 = vshrl.u32 %v2289_v27, 16 }
  0x53   : > { %2734 = vmatpush3.bf16.msra.mxu1 %v3258_v11  ;;  %2702 = vmatpush3.bf16.msra.mxu0 %v3237_v45  ;;  %v890_v45 = vrot.slane %v888_v5, 5  ;;  %v628_v22 = vsel %vm3057_vm6, %v623_v13, %v627_v62  ;;  %v633_v38 = vshll.u32 %v2289_v27, 16  ;;  %v760_v39 = vsel %vm3051_vm5, %v2322_v26, %v759_v31  ;;  %v2349_v47 = vld [vmem:[%s3027_s14 + $0x30] sm:$0xf]  ;;  %v2350_v55 = vld [vmem:[%s3027_s14 + $0x34] sm:$0x1] }
  0x54   : > { %2727 = vmatprep.subr.bf16.mxu1 %v3267_v24  ;;  %2703 = vmatprep.subr.bf16.mxu0 %v3258_v11  ;;  %v2298_v29 = vcombine.low %v614_v12, %v628_v22  ;;  %v639_v40 = vshll.u32 %v2290_v28, 16  ;;  %v644_v41 = vshrl.u32 %v2291_v32, 16  ;;  %v2327_v43 = vcombine.low %v756_v36, %v760_v39  ;;  %v2351_v59 = vld [vmem:[%s3027_s14 + $0x38] sm:$0xf]  ;;  %v2352_v60 = vld [vmem:[%s3027_s14 + $0x3c] sm:$0x1] }
  0x55   : > { %v891_v23 = vor.u32 %v890_v45, %v887_v8  ;;  %v632_v44 = vrot.slane %v630_v37, 4  ;;  %v635_v46 = vrot.slane %v633_v38, 5  ;;  %v647_v54 = vshll.u32 %v2291_v32, 16  ;;  %v3353_v9 = vld [vmem:[%s3450_s1 + $0x238] sm:$0xff]   ;;  %v2316_v18 = vld [vmem:[%s3027_s14 + $0x44] sm:$0x1] }
  0x56   : > { %1955 = vmatmul.mubr.bf16.gmra.mrb[20].mxu1 %v2298_v29  ;;  %v641_v50 = vrot.slane %v639_v40, 5  ;;  %v646_v52 = vrot.slane %v644_v41, 4  ;;  %v653_v58 = vshll.u32 %v2292_v33, 16  ;;  %v899_v61 = vshrl.u32 %v2349_v47, 16  ;;  %v2313_v45 = vld [vmem:[%s3027_s14 + $0x38] sm:$0xe] }
  0x57   : > { %2735 = vmatpush3.bf16.msra.mxu1 %v3267_v24  ;;  %2704 = vmatpush3.bf16.msra.mxu0 %v3258_v11  ;;  %v892_v34 = vrot.slane %v891_v23, 4  ;;  %v883_v11 = vsel %vm3057_vm6, %v878_v30, %v882_v7  ;;  %v636_v57 = vor.u32 %v635_v46, %v632_v44  ;;  %v902_v62 = vshll.u32 %v2349_v47, 16  ;;  %v2314_v14 = vld [vmem:[%s3027_s14 + $0x3c] sm:$0x1]  ;;  %v2293_v26 = vld [vmem:[%s3027_s14 + $0x38] sm:$0xf] }
  0x58   : > { %2728 = vmatprep.subr.bf16.mxu1 %v3288_v49  ;;  %2705 = vmatprep.subr.bf16.mxu0 %v3267_v24  ;;  %v908_v63 = vshll.u32 %v2350_v55, 16  ;;  %v913_v0 = vshrl.u32 %v2351_v59, 16  ;;  %v655_v2 = vrot.slane %v653_v58, 5  ;;  %v901_v3 = vrot.slane %v899_v61, 4  ;;  %v2294_v30 = vld [vmem:[%s3027_s14 + $0x3c] sm:$0x1] }
  0x59   : > { %v897_v42 = vsel %vm3057_vm6, %v892_v34, %v896_v17  ;;  %1962 = vmatprep.mubr.bf16.mxu1 %v2327_v43  ;;  %v637_v1 = vrot.slane %v636_v57, 4  ;;  %v916_v4 = vshll.u32 %v2351_v59, 16  ;;  %v904_v6 = vrot.slane %v902_v62, 5  ;;  %v2315_v17 = vld [vmem:[%s3027_s14 + $0x40] sm:$0xe] }
  0x5a   : > { %v2358_v48 = vcombine.low %v883_v11, %v897_v42  ;;  %v910_v7 = vrot.slane %v908_v63, 5  ;;  %v915_v8 = vrot.slane %v913_v0, 4  ;;  %v922_v13 = vshll.u32 %v2352_v60, 16  ;;  %v2295_v31 = vld [vmem:[%s3027_s14 + $0x40] sm:$0xf] }
  0x5b   : > { %2736 = vmatpush3.bf16.msra.mxu1 %v3288_v49  ;;  %2706 = vmatpush3.bf16.msra.mxu0 %v3267_v24  ;;  %v649_v24 = vrot.slane %v647_v54, 5  ;;  %v918_v12 = vrot.slane %v916_v4, 5  ;;  %v905_v16 = vor.u32 %v904_v6, %v901_v3  ;;  %v2323_v19 = vrot.slane %v2313_v45, 9  ;;  %v2875_v34 = vld [vmem:[%s3027_s14 + $0x30] ss:$8 sps:$4 sm:$0xff]  }
  0x5c   : > { %2729 = vmatprep.subr.bf16.mxu1 %v3301_v10  ;;  %2707 = vmatprep.subr.bf16.mxu0 %v3288_v49  ;;  %v924_v22 = vrot.slane %v922_v13, 5  ;;  %v763_v23 = vrot.slane %v2314_v14, 5  ;;  %v2324_v25 = vrot.slane %v2315_v17, 9  ;;  %v767_v29 = vrot.slane %v2316_v18, 5  ;;  %v2296_v36 = vld [vmem:[%s3027_s14 + $0x44] sm:$0x1] }
  0x5d   : > { %2019 = vmatprep.mubr.bf16.mxu0 %v2358_v48  ;;  %v650_v5 = vor.u32 %v649_v24, %v646_v52  ;;  %v919_v20 = vor.u32 %v918_v12, %v915_v8  ;;  %v906_v28 = vrot.slane %v905_v16, 4  ;;  %v658_v37 = vshrl.u32 %v2293_v26, 16  ;;  %v2353_v44 = vld [vmem:[%s3027_s14 + $0x40] sm:$0xf]  ;;  %v2354_v52 = vld [vmem:[%s3027_s14 + $0x44] sm:$0x1] }
  0x5e   : > { %2020 = vmatmul.mubr.bf16.gmra.mrb[28].mxu0 %v2872_v35  ;;  %v764_v35 = vsel %vm3051_vm5, %v2323_v19, %v763_v23  ;;  %v661_v11 = vshll.u32 %v2293_v26, 16  ;;  %v667_v39 = vshll.u32 %v2294_v30, 16  ;;  %v672_v43 = vshrl.u32 %v2295_v31, 16  ;;  %v2355_v57 = vld [vmem:[%s3027_s14 + $0x48] sm:$0xf] }
  0x5f   : > { %2737 = vmatpush3.bf16.msra.mxu1 %v3301_v10  ;;  %2708 = vmatpush3.bf16.msra.mxu0 %v3288_v49  ;;  %v642_v49 = vsel %vm3057_vm6, %v637_v1, %v641_v50  ;;  %v651_v15 = vrot.slane %v650_v5, 4  ;;  %v920_v33 = vrot.slane %v919_v20, 4  ;;  %v911_v38 = vsel %vm3057_vm6, %v906_v28, %v910_v7  ;;  %v2356_v58 = vld [vmem:[%s3027_s14 + $0x4c] sm:$0x1]  ;;  %v2369_v12 = vld [vmem:[%s3027_s14 + $0x30] sm:$0xe] }
  0x60   : > { %2730 = vmatprep.subr.bf16.mxu1 %v3313_v21  ;;  %2709 = vmatprep.subr.bf16.mxu0 %v3301_v10  ;;  %v660_v42 = vrot.slane %v658_v37, 4  ;;  %v663_v47 = vrot.slane %v661_v11, 5  ;;  %v669_v48 = vrot.slane %v667_v39, 5  ;;  %v675_v50 = vshll.u32 %v2295_v31, 16  ;;  %v2372_v18 = vld [vmem:[%s3027_s14 + $0x3c] sm:$0x1] }
  0x61   : > { %v656_v27 = vsel %vm3057_vm6, %v651_v15, %v655_v2  ;;  %v925_v40 = vsel %vm3057_vm6, %v920_v33, %v924_v22  ;;  %v674_v54 = vrot.slane %v672_v43, 4  ;;  %v681_v55 = vshll.u32 %v2296_v36, 16  ;;  %v2371_v15 = vld [vmem:[%s3027_s14 + $0x38] sm:$0xe]  ;;  %v2373_v26 = vld [vmem:[%s3027_s14 + $0x40] sm:$0xe] }
  0x62   : > { %v2299_v32 = vcombine.low %v642_v49, %v656_v27  ;;  %v2359_v46 = vcombine.low %v911_v38, %v925_v40  ;;  %v664_v59 = vor.u32 %v663_v47, %v660_v42  ;;  %v677_v60 = vrot.slane %v675_v50, 5  ;;  %v2370_v49 = vld [vmem:[%s3027_s14 + $0x34] sm:$0x1]  ;;  %v2374_v27 = vld [vmem:[%s3027_s14 + $0x44] sm:$0x1] }
  0x63   : > { %2738 = vmatpush3.bf16.msra.mxu1 %v3313_v21  ;;  %2710 = vmatpush3.bf16.msra.mxu0 %v3301_v10  ;;  %v768_v10 = vsel %vm3051_vm5, %v2324_v25, %v767_v29  ;;  %v927_v61 = vshrl.u32 %v2353_v44, 16  ;;  %v930_v24 = vshll.u32 %v2353_v44, 16  ;;  %v683_v62 = vrot.slane %v681_v55, 5  ;;  %v2878_v30 = vld [vmem:[%s3027_s14 + $0x40] ss:$8 sps:$4 sm:$0xff]  }
  0x64   : > { %2731 = vmatprep.subr.bf16.mxu1 %v3342_v56  ;;  %2711 = vmatprep.subr.bf16.mxu0 %v3313_v21  ;;  %v2328_v41 = vcombine.low %v764_v35, %v768_v10  ;;  %v936_v63 = vshll.u32 %v2354_v52, 16  ;;  %v944_v0 = vshll.u32 %v2355_v57, 16  ;;  %v665_v1 = vrot.slane %v664_v59, 4  ;;  %v2376_v33 = vld [vmem:[%s3027_s14 + $0x4c] sm:$0x1] }
  0x65   : > { %1963 = vmatmul.mubr.bf16.gmra.mrb[24].mxu1 %v2299_v32  ;;  %2027 = vmatprep.mubr.bf16.mxu0 %v2359_v46  ;;  %v678_v2 = vor.u32 %v677_v60, %v674_v54  ;;  %v929_v3 = vrot.slane %v927_v61, 4  ;;  %v932_v4 = vrot.slane %v930_v24, 5  ;;  %v950_v8 = vshll.u32 %v2356_v58, 16  ;;  %v2375_v32 = vld [vmem:[%s3027_s14 + $0x48] sm:$0xe] }
  0x66   : > { %1970 = vmatprep.mubr.bf16.mxu1 %v2328_v41  ;;  %2028 = vmatmul.mubr.bf16.gmra.mrb[32].mxu0 %v2875_v34  ;;  %v938_v5 = vrot.slane %v936_v63, 5  ;;  %v946_v7 = vrot.slane %v944_v0, 5  ;;  %v670_v13 = vsel %vm3057_vm6, %v665_v1, %v669_v48  ;;  %v2381_v16 = vrot.slane %v2369_v12, 9  ;;  %v2361_v38 = vld [vmem:[%s3027_s14 + $0x10] sm:$0xe] }
  0x67   : > { %2739 = vmatpush3.bf16.msra.mxu1 %v3342_v56  ;;  %2712 = vmatpush3.bf16.msra.mxu0 %v3313_v21  ;;  %v941_v21 = vshrl.u32 %v2355_v57, 16  ;;  %v679_v45 = vrot.slane %v678_v2, 4  ;;  %v933_v14 = vor.u32 %v932_v4, %v929_v3  ;;  %v952_v17 = vrot.slane %v950_v8, 5  ;;  %v2362_v10 = vld [vmem:[%s3027_s14 + $0x14] sm:$0x1] }
  0x68   : > { %2732 = vmatprep.subr.bf16.mxu1 %v3353_v9  ;;  %2713 = vmatprep.subr.bf16.mxu0 %v3342_v56  ;;  %v1024_v19 = vrot.slane %v2370_v49, 5  ;;  %v2382_v20 = vrot.slane %v2371_v15, 9  ;;  %v1028_v25 = vrot.slane %v2372_v18, 5  ;;  %v2383_v34 = vrot.slane %v2373_v26, 9  ;;  %v2363_v41 = vld [vmem:[%s3027_s14 + $0x18] sm:$0xe] }
  0x69   : > { %v943_v6 = vrot.slane %v941_v21, 4  ;;  %v684_v22 = vsel %vm3057_vm6, %v679_v45, %v683_v62  ;;  %v934_v23 = vrot.slane %v933_v14, 4  ;;  %v1032_v37 = vrot.slane %v2374_v27, 5  ;;  %v2364_v42 = vld [vmem:[%s3027_s14 + $0x1c] sm:$0x1] }
  0x6a   : > { %v2300_v28 = vcombine.low %v670_v13, %v684_v22  ;;  %v1025_v31 = vsel %vm3051_vm5, %v2381_v16, %v1024_v19  ;;  %v1029_v36 = vsel %vm3051_vm5, %v2382_v20, %v1028_v25  ;;  %v1036_v40 = vrot.slane %v2376_v33, 5  ;;  %v2365_v50 = vld [vmem:[%s3027_s14 + $0x20] sm:$0xe]  ;;  %v2366_v52 = vld [vmem:[%s3027_s14 + $0x24] sm:$0x1] }
  0x6b   : > { %2740 = vmatpush3.bf16.msra.mxu1 %v3353_v9  ;;  %2714 = vmatpush3.bf16.msra.mxu0 %v3342_v56  ;;  %v947_v56 = vor.u32 %v946_v7, %v943_v6  ;;  %v939_v35 = vsel %vm3057_vm6, %v934_v23, %v938_v5  ;;  %v2387_v39 = vcombine.low %v1025_v31, %v1029_v36  ;;  %v2377_v43 = vrot.slane %v2361_v38, 9  ;;  %v2367_v55 = vld [vmem:[%s3027_s14 + $0x28] sm:$0xe]  ;;  %v2368_v57 = vld [vmem:[%s3027_s14 + $0x2c] sm:$0x1] }
  0x6c   : > { %2715 = vmatprep.subr.bf16.mxu0 %v3353_v9  ;;  %v1033_v46 = vsel %vm3051_vm5, %v2383_v34, %v1032_v37  ;;  %v1008_v47 = vrot.slane %v2362_v10, 5  ;;  %v2378_v48 = vrot.slane %v2363_v41, 9  ;;  %v1012_v54 = vrot.slane %v2364_v42, 5 }
  0x6d   : > { %v948_v29 = vrot.slane %v947_v56, 4  ;;  %1971 = vmatmul.mubr.bf16.gmra.mrb[28].mxu1 %v2300_v28  ;;  %v2379_v58 = vrot.slane %v2365_v50, 9  ;;  %v1016_v60 = vrot.slane %v2366_v52, 5  ;;  %v2380_v61 = vrot.slane %v2367_v55, 9 }
  0x6e   : > { %2721 = vmatprep.mubr.bf16.mxu1 %v2387_v39  ;;  %v1009_v59 = vsel %vm3051_vm5, %v2377_v43, %v1008_v47  ;;  %v1013_v62 = vsel %vm3051_vm5, %v2378_v48, %v1012_v54  ;;  %v1020_v63 = vrot.slane %v2368_v57, 5 }
  0x6f   : > { %2716 = vmatpush3.bf16.msra.mxu0 %v3353_v9  ;;  %v2384_v9 = vrot.slane %v2375_v32, 9  ;;  %v953_v11 = vsel %vm3057_vm6, %v948_v29, %v952_v17  ;;  %v2385_v21 = vcombine.low %v1009_v59, %v1013_v62  ;;  %v1017_v0 = vsel %vm3051_vm5, %v2379_v58, %v1016_v60 }
  0x70   : > { %v2360_v44 = vcombine.low %v939_v35, %v953_v11  ;;  %v1021_v1 = vsel %vm3051_vm5, %v2380_v61, %v1020_v63 }
  0x71   : > { %v1037_v53 = vsel %vm3051_vm5, %v2384_v9, %v1036_v40  ;;  %v2386_v2 = vcombine.low %v1017_v0, %v1021_v1 }
  0x72   : > { %2035 = vmatprep.mubr.bf16.mxu0 %v2360_v44  ;;  %v2388_v24 = vcombine.low %v1033_v46, %v1037_v53 }
  0x73   : > { %2036 = vmatmul.mubr.bf16.gmra.mrb[36].mxu0 %v2878_v30 }
  0x74   : > { %2717 = vmatprep.mubr.bf16.mxu0 %v2385_v21 }
  0x75   : > { %2722 = vmatmul.mubr.bf16.vlgmr.msra.gmra.mrb[32].mxu1 %v2388_v24 }
  0x7b   : > { %2718 = vmatmul.mubr.bf16.vlgmr.msra.gmra.mrb[0].mxu0 %v2386_v2 }
  0xed   : > { %v2699_v3 = vpop.f32.mrb[4].mxu0 }
  0xee   : > { %v1337_v4 = vpop.f32.mrb[5].mxu0 }
  0xef   : > { %v2700_v5 = vpop.f32.mrb[6].mxu0 }
  0xf0   : > { %v1340_v6 = vpop.f32.mrb[7].mxu0 }
  0xf9   : > { %v2535_v7 = vpop.f32.mrb[0].mxu1 }
  0xfa   : > { %v2536_v8 = vpop.f32.mrb[1].mxu1 }
  0xfb   : > { %v2537_v12 = vadd.f32 %v2536_v8, %v2535_v7  ;;  %v2538_v13 = vpop.f32.mrb[2].mxu1 }
  0xfc   : > { %v2539_v45 = vpop.f32.mrb[3].mxu1 }
  0xfd   : > { %v2540_v49 = vadd.f32 %v2539_v45, %v2538_v13 }
 0x105   : > { %v2575_v14 = vpop.f32.mrb[8].mxu0  ;;  %v2541_v20 = vpop.f32.mrb[4].mxu1 }
 0x106   : > { %v2576_v15 = vpop.f32.mrb[9].mxu0  ;;  %v2542_v22 = vpop.f32.mrb[5].mxu1 }
 0x107   : > { %v2577_v16 = vadd.f32 %v2576_v15, %v2575_v14  ;;  %v2578_v56 = vpop.f32.mrb[10].mxu0  ;;  %v2543_v23 = vadd.f32 %v2542_v22, %v2541_v20  ;;  %v2544_v25 = vpop.f32.mrb[6].mxu1 }
 0x108   : > { %v2579_v51 = vpop.f32.mrb[11].mxu0  ;;  %v2545_v26 = vpop.f32.mrb[7].mxu1 }
 0x109   : > { %v2745_v17 = vadd.f32 %v2577_v16, %v2537_v12  ;;  %v2580_v18 = vadd.f32 %v2579_v51, %v2578_v56  ;;  %v2546_v28 = vadd.f32 %v2545_v26, %v2544_v25 }
 0x10b   : > { %v2753_v19 = vadd.f32 %v2580_v18, %v2540_v49 }
 0x10d   : > { %v2581_v27 = vpop.f32.mrb[12].mxu0 }
 0x10e   : > { %v2582_v29 = vpop.f32.mrb[13].mxu0 }
 0x10f   : > { %v2583_v30 = vadd.f32 %v2582_v29, %v2581_v27  ;;  %v2584_v31 = vpop.f32.mrb[14].mxu0 }
 0x110   : > { %v2585_v32 = vpop.f32.mrb[15].mxu0 }
 0x111   : > { %v2741_v33 = vadd.f32 %v2583_v30, %v2543_v23  ;;  %v2586_v34 = vadd.f32 %v2585_v32, %v2584_v31  ;;  %v2547_v36 = vpop.f32.mrb[8].mxu1 }
 0x112   : > { %v2548_v37 = vpop.f32.mrb[9].mxu1 }
 0x113   : > { %v2749_v35 = vadd.f32 %v2586_v34, %v2546_v28  ;;  %v2549_v9 = vadd.f32 %v2548_v37, %v2547_v36  ;;  %v2550_v38 = vpop.f32.mrb[10].mxu1 }
 0x114   : > { %v2551_v10 = vpop.f32.mrb[11].mxu1 }
 0x115   : > { %v1835_v11 = vadd.f32 %v2549_v9, %v1337_v4  ;;  %v2552_v39 = vadd.f32 %v2551_v10, %v2550_v38  ;;  %v2587_v40 = vpop.f32.mrb[16].mxu0 }
 0x116   : > { %v2588_v42 = vpop.f32.mrb[17].mxu0 }
 0x117   : > { %v1838_v41 = vadd.f32 %v2552_v39, %v1340_v6  ;;  %v2589_v43 = vadd.f32 %v2588_v42, %v2587_v40  ;;  %v2590_v44 = vpop.f32.mrb[18].mxu0 }
 0x118   : > { %v2591_v46 = vpop.f32.mrb[19].mxu0 }
 0x119   : > { %v1900_v47 = vadd.f32 %v2589_v43, %v1835_v11  ;;  %v2592_v48 = vadd.f32 %v2591_v46, %v2590_v44  ;;  %v2553_v52 = vpop.f32.mrb[12].mxu1 }
 0x11a   : > { %v2554_v53 = vpop.f32.mrb[13].mxu1 }
 0x11b   : > { %v1903_v50 = vadd.f32 %v2592_v48, %v1838_v41  ;;  %v2555_v54 = vadd.f32 %v2554_v53, %v2553_v52  ;;  %v2556_v55 = vpop.f32.mrb[14].mxu1 }
 0x11c   : > { %v2557_v57 = vpop.f32.mrb[15].mxu1 }
 0x11d   : > { %v1843_v58 = vadd.f32 %v2699_v3, %v2555_v54  ;;  %v2558_v59 = vadd.f32 %v2557_v57, %v2556_v55  ;;  %v2593_v60 = vpop.f32.mrb[20].mxu0 }
 0x11e   : > { %v2594_v61 = vpop.f32.mrb[21].mxu0 }
 0x11f   : > { %v1846_v24 = vadd.f32 %v2700_v5, %v2558_v59  ;;  %v2595_v62 = vadd.f32 %v2594_v61, %v2593_v60  ;;  %v2596_v63 = vpop.f32.mrb[22].mxu0 }
 0x120   : > { %v2597_v21 = vpop.f32.mrb[23].mxu0 }
 0x121   : > { %v1908_v0 = vadd.f32 %v2595_v62, %v1843_v58  ;;  %v2598_v1 = vadd.f32 %v2597_v21, %v2596_v63  ;;  %v2615_v4 = vpop.f32.mrb[16].mxu1 }
 0x122   : > { %v2616_v6 = vpop.f32.mrb[17].mxu1 }
 0x123   : > { %v1911_v2 = vadd.f32 %v2598_v1, %v1846_v24  ;;  %v2617_v7 = vadd.f32 %v2616_v6, %v2615_v4  ;;  %v2618_v8 = vpop.f32.mrb[18].mxu1 }
 0x124   : > { %v2619_v12 = vpop.f32.mrb[19].mxu1 }
 0x125   : > { %v2746_v13 = vadd.f32 %v2745_v17, %v2617_v7  ;;  %v2620_v45 = vadd.f32 %v2619_v12, %v2618_v8  ;;  %v2655_v49 = vpop.f32.mrb[24].mxu0  ;;  %v2470_v7 = vld [vmem:[%s3451_s2] ss:$0 sm:$0xff] }
 0x126   : > { %v2656_v3 = vpop.f32.mrb[25].mxu0 }
 0x127   : > { %v2754_v14 = vadd.f32 %v2753_v19, %v2620_v45  ;;  %v2657_v15 = vadd.f32 %v2656_v3, %v2655_v49  ;;  %v2658_v16 = vpop.f32.mrb[26].mxu0 }
 0x128   : > { %v2659_v56 = vpop.f32.mrb[27].mxu0 }
 0x129   : > { %v2660_v5 = vadd.f32 %v2659_v56, %v2658_v16  ;;  %v3432_v51 = vadd.f32 %v2746_v13, %v2657_v15  ;;  %v2621_v20 = vpop.f32.mrb[20].mxu1 }
 0x12a   : > { %v2622_v22 = vpop.f32.mrb[21].mxu1 }
 0x12b   : > { %v3434_v18 = vadd.f32 %v2754_v14, %v2660_v5  ;;  %v2623_v23 = vadd.f32 %v2622_v22, %v2621_v20  ;;  %v2624_v25 = vpop.f32.mrb[22].mxu1 }
 0x12c   : > { %v2625_v26 = vpop.f32.mrb[23].mxu1 }
 0x12d   : > { %v2742_v27 = vadd.f32 %v2741_v33, %v2623_v23  ;;  %v2626_v28 = vadd.f32 %v2625_v26, %v2624_v25 }
 0x12f   : > { %v2750_v29 = vadd.f32 %v2749_v35, %v2626_v28 }
 0x131   : > { %v2661_v17 = vpop.f32.mrb[28].mxu0 }
 0x132   : > { %v2662_v19 = vpop.f32.mrb[29].mxu0 }
 0x133   : > { %v2663_v30 = vadd.f32 %v2662_v19, %v2661_v17  ;;  %v2664_v31 = vpop.f32.mrb[30].mxu0 }
 0x134   : > { %v2665_v32 = vpop.f32.mrb[31].mxu0 }
 0x135   : > { %v2666_v34 = vadd.f32 %v2665_v32, %v2664_v31  ;;  %v2743_v36 = vadd.f32 %v2742_v27, %v2663_v30 }
 0x137   : > { %v2751_v37 = vadd.f32 %v2750_v29, %v2666_v34 }
 0x138   : > { %v2627_v9 = vpop.f32.mrb[24].mxu1 }
 0x139   : > { %v2628_v38 = vpop.f32.mrb[25].mxu1  ;;  %v2667_v42 = vpop.f32.mrb[32].mxu0 }
 0x13a   : > { %v2629_v10 = vadd.f32 %v2628_v38, %v2627_v9  ;;  %v2630_v11 = vpop.f32.mrb[26].mxu1  ;;  %v2668_v43 = vpop.f32.mrb[33].mxu0 }
 0x13b   : > { %v2631_v39 = vpop.f32.mrb[27].mxu1  ;;  %v2669_v44 = vadd.f32 %v2668_v43, %v2667_v42  ;;  %v2670_v46 = vpop.f32.mrb[34].mxu0 }
 0x13c   : > { %v1965_v40 = vadd.f32 %v2629_v10, %v1900_v47  ;;  %v2632_v41 = vadd.f32 %v2631_v39, %v2630_v11  ;;  %v2671_v35 = vpop.f32.mrb[35].mxu0 }
 0x13d   : > { %v2672_v48 = vadd.f32 %v2671_v35, %v2670_v46 }
 0x13e   : > { %v1968_v33 = vadd.f32 %v2632_v41, %v1903_v50  ;;  %v2030_v52 = vadd.f32 %v2669_v44, %v1965_v40 }
 0x140   : > { %v2033_v53 = vadd.f32 %v2672_v48, %v1968_v33  ;;  %v2633_v54 = vpop.f32.mrb[28].mxu1 }
 0x141   : > { %v2634_v55 = vpop.f32.mrb[29].mxu1 }
 0x142   : > { %v2635_v57 = vadd.f32 %v2634_v55, %v2633_v54  ;;  %v2636_v58 = vpop.f32.mrb[30].mxu1 }
 0x143   : > { %v2637_v59 = vpop.f32.mrb[31].mxu1 }
 0x144   : > { %v1973_v60 = vadd.f32 %v2635_v57, %v1908_v0  ;;  %v2638_v61 = vadd.f32 %v2637_v59, %v2636_v58 }
 0x146   : > { %v2673_v24 = vpop.f32.mrb[36].mxu0  ;;  %v1976_v47 = vadd.f32 %v2638_v61, %v1911_v2 }
 0x147   : > { %v2674_v62 = vpop.f32.mrb[37].mxu0 }
 0x148   : > { %v2675_v63 = vadd.f32 %v2674_v62, %v2673_v24  ;;  %v2676_v21 = vpop.f32.mrb[38].mxu0  ;;  %v2723_v4 = vpop.f32.mrb[32].mxu1 }
 0x149   : > { %v2677_v1 = vpop.f32.mrb[39].mxu0  ;;  %v2094_v8 = vpop.f32.mrb[33].mxu1 }
 0x14a   : > { %v2038_v50 = vadd.f32 %v2675_v63, %v1973_v60  ;;  %v2678_v6 = vadd.f32 %v2677_v1, %v2676_v21  ;;  %v2095_v13 = vadd.f32 %v2094_v8, %v2030_v52  ;;  %v2724_v14 = vpop.f32.mrb[34].mxu1 }
 0x14b   : > { %v2097_v0 = vpop.f32.mrb[35].mxu1 }
 0x14c   : > { %v2103_v12 = vadd.f32 %v2723_v4, %v2038_v50  ;;  %v2041_v45 = vadd.f32 %v2678_v6, %v1976_v47  ;;  %v2120_v3 = vadd.f32 %v2470_v7, %v2095_v13  ;;  %v2098_v2 = vadd.f32 %v2097_v0, %v2033_v53 }
 0x14e   : > { %v2122_v49 = vadd.f32 %v2470_v7, %v2103_v12  ;;  %v2106_v15 = vadd.f32 %v2724_v14, %v2041_v45  ;;  %v2719_v16 = vpop.f32.mrb[0].mxu0  ;;  %v2121_v22 = vadd.f32 %v2470_v7, %v2098_v2  ;;  %v2128_v29 = vmax.f32 %v2120_v3, 0.0 }
 0x14f   : > { %v2744_v56 = vadd.f32 %v2743_v36, %v2719_v16  ;;  %v2078_v5 = vpop.f32.mrb[1].mxu0 }
 0x150   : > { %v2123_v20 = vadd.f32 %v2470_v7, %v2106_v15  ;;  %v2720_v23 = vpop.f32.mrb[2].mxu0  ;;  %v2130_v25 = vmax.f32 %v2122_v49, 0.0  ;;  %v2748_v27 = vadd.f32 %v3432_v51, %v2078_v5  ;;  %v2129_v30 = vmax.f32 %v2121_v22, 0.0 }
 0x151   : > { %v2118_v26 = vadd.f32 %v2744_v56, %v2470_v7  ;;  %v2752_v28 = vadd.f32 %v2751_v37, %v2720_v23  ;;  %v2081_v17 = vpop.f32.mrb[3].mxu0 }
 0x152   : > { %v2131_v19 = vmax.f32 %v2123_v20, 0.0  ;;  %v2756_v31 = vadd.f32 %v3434_v18, %v2081_v17  ;;  %v2116_v32 = vadd.f32 %v2748_v27, %v2470_v7  ;;  %v2504_v9 = vpack.c.bf16 %v2129_v30, %v2128_v29 }
 0x153   : > { %v2119_v34 = vadd.f32 %v2752_v28, %v2470_v7  ;;  %v2126_v10 = vmax.f32 %v2118_v26, 0.0 }
 0x154   : > { %v2509_v36 = vpack.c.bf16 %v2131_v19, %v2130_v25  ;;  %v2117_v38 = vadd.f32 %v2756_v31, %v2470_v7  ;;  %2512 = vst [vmem:[%s244_s27 + $0x10] sm:$0xff] %v2504_v9   ;;  %v2124_v51 = vmax.f32 %v2116_v32, 0.0 }
 0x155   : > { %v2127_v11 = vmax.f32 %v2119_v34, 0.0 }
 0x156   : > { %2513 = vst [vmem:[%s244_s27 + $0x18] sm:$0xff] %v2509_v36   ;;  %v2125_v37 = vmax.f32 %v2117_v38, 0.0 }
 0x157   : > { %v2499_v39 = vpack.c.bf16 %v2127_v11, %v2126_v10 }
 0x158   : > { %v2494_v40 = vpack.c.bf16 %v2125_v37, %v2124_v51 }
 0x159   : > { %2511 = vst [vmem:[%s244_s27 + $0x8] sm:$0xff] %v2499_v39  }
 0x15a   : > { %2495 = vst [vmem:[%s244_s27] sm:$0xff] %v2494_v40  }
 0x15b PF: > { %s15_s18 = sadd.s32 1, %s2885_s18  }
 0x15c   : > { %p12_p4 = scmp.ge.s32.totalorder %s15_s18, 4  }
 0x15e   :  { %14 = sbr.rel (!%p12_p4) target bundleno = 1 (0x1), region = 75 }

</bundles_post_ra>
